<compile_context>
chip_gen: v5e
topology: v5e:2x2
jax: 0.10.0
libtpu: 0.0.40
codegen_flags: <defaults>
</compile_context>

<pallas_src>
import math
import numpy as np
import jax
import jax.numpy as jnp
from jax.experimental import pallas as pl
from jax.experimental.pallas import tpu as pltpu

# ---- module-consistent sizes -------------------------------------------------
STATE_DIM = 32
HIDDEN = 64
T_EMB_DIM = 16
WRIST_DIM = 8           # actor_wrist output
FINGER_DIM = 36         # actor_finger (diffusion) output
SUSTAIN_DIM = 1         # actor_sustain output
ACTION_DIM = WRIST_DIM + FINGER_DIM + SUSTAIN_DIM   # 45
N_TIMESTEPS = 5         # args.n_timesteps
NOISE_RATIO = 0.1       # args.noise_ratio

PAD = 64                # common padded lane width for state/action/hidden
BATCH = 8               # >= 8 fills one f32 vreg sublane dim (perf review #1)
BATCH_BLOCK = 8         # grid block over batch; shards across TCs on v7x

HIGHEST = jax.lax.Precision.HIGHEST

# action_postprocessing column layout:
#   [wrist[:, :4] | finger[:, :18] | wrist[:, 4:] | finger[:, 18:] | sustain]
WRIST_COLS = np.array([0, 1, 2, 3, 22, 23, 24, 25], dtype=np.int32)
FINGER_COLS = np.array(list(range(4, 22)) + list(range(26, 44)), dtype=np.int32)
SUSTAIN_COL = 44

# weight-slab / bias-slab indices
NW = 13
(W_W1, W_W2, W_W3, W_WEMB, W_F1X, W_F1S, W_F2, W_F3, W_F4,
 W_FEMB, W_S1, W_S2, W_S3) = range(NW)
NB = 11
(B_W1, B_W2, B_W3, B_WEMB, B_F2, B_F3, B_F4, B_FEMB,
 B_S1, B_S2, B_S3) = range(NB)
# folded per-step first-layer bias (time embedding + fb1) lives at NB + step


# ---- activations -------------------------------------------------------------
def _mish_exact(x):
    # mish(x) = x * tanh(softplus(x)); overflow-safe (host / reference only)
    sp = jnp.maximum(x, 0.0) + jnp.log1p(jnp.exp(-jnp.abs(x)))
    return x * jnp.tanh(sp)


def _mish_fast(x):
    # 2-EUP mish: tanh(log1p(e)) == e(e+2) / (e(e+2)+2), e = exp(x)
    e = jnp.exp(jnp.minimum(x, 20.0))
    u = e * (e + 2.0)
    return x * u * pl.reciprocal(u + 2.0, approx=True)


# ---- fused Pallas kernel (schedule constants baked in as Python floats) ------
def make_actor_kernel(consts, n_steps):
    consts = tuple(float(c) for c in consts)      # 5 scalars per diffusion step

    def kernel(acts_ref, w_ref, b_ref, o_ref):
        # bf16 matmul inputs, f32 accumulation (perf review: MXU single pass)
        def dot(a, wi):
            return jnp.dot(a.astype(jnp.bfloat16), w_ref[wi],
                           preferred_element_type=jnp.float32)

        state = acts_ref[0]                       # [BB, 64] f32, lanes 32: zero

        # ---- actor_wrist MLP (head pre-scattered into the 45/64-lane space)
        h = _mish_fast(dot(state, W_W1) + b_ref[B_W1])
        h = _mish_fast(dot(h, W_W2) + b_ref[B_W2])
        a_wrist = jnp.tanh(dot(h, W_W3) + b_ref[B_W3])

        # ---- wrist_embedding (detach is a no-op in forward)
        wrist_emb = dot(a_wrist, W_WEMB) + b_ref[B_WEMB]
        s_fing = state + wrist_emb
        s_term = dot(s_fing, W_F1S)               # step-invariant first-layer term

        # ---- actor_finger: reverse diffusion, fully unrolled
        x = acts_ref[1]                           # x_T scattered to action lanes
        for step in range(n_steps):               # step i <-> t = T-1-i
            c0, c1, c2, c3, c4 = consts[5 * step: 5 * step + 5]
            h1 = _mish_fast(dot(x, W_F1X) + s_term + b_ref[NB + step])
            h2 = _mish_fast(dot(h1, W_F2) + b_ref[B_F2])
            h3 = _mish_fast(dot(h2, W_F3) + b_ref[B_F3])
            eps = dot(h3, W_F4) + b_ref[B_F4]
            x_recon = jnp.clip(c0 * x - c1 * eps, -1.0, 1.0)
            x = c2 * x_recon + c3 * x
            if c4 != 0.0:                         # no noise at t==0 / eval
                x = x + c4 * acts_ref[2 + step]
        a_finger = jnp.clip(x, -1.0, 1.0)

        # ---- finger_embedding + actor_sustain
        finger_emb = dot(a_finger, W_FEMB) + b_ref[B_FEMB]
        s_sus = s_fing + finger_emb
        h = _mish_fast(dot(s_sus, W_S1) + b_ref[B_S1])
        h = _mish_fast(dot(h, W_S2) + b_ref[B_S2])
        a_sustain = jnp.tanh(dot(h, W_S3) + b_ref[B_S3])

        # action_postprocessing is already folded into the head weights:
        # the three terms occupy disjoint lanes of the 45-lane action space.
        out = a_wrist + a_finger + a_sustain
        o_ref[...] = out[:, :ACTION_DIM]

    return kernel


# ---- pallas_call wrapper ------------------------------------------------------
def scatter_finger(x36):
    """Scatter a (..., 36) finger tensor into the padded 64-lane action space."""
    out = jnp.zeros(x36.shape[:-1] + (PAD,), x36.dtype)
    return out.at[..., FINGER_COLS].set(x36)


def make_actor_forward(consts, batch_block=BATCH_BLOCK, n_steps=N_TIMESTEPS):
    kernel = make_actor_kernel(consts, n_steps)
    bb = batch_block

    def fwd(w_slab, b_slab, state, x_init, step_noise):
        batch = state.shape[0]
        assert batch % bb == 0, (batch, bb)
        state64 = jnp.pad(state, ((0, 0), (0, PAD - STATE_DIM)))
        x0_64 = scatter_finger(x_init)
        noise64 = scatter_finger(step_noise)
        # one activation slab -> one input DMA
        acts = jnp.concatenate([state64[None], x0_64[None], noise64], axis=0)
        nb_tot = b_slab.shape[0]
        return pl.pallas_call(
            kernel,
            out_shape=jax.ShapeDtypeStruct((batch, ACTION_DIM), jnp.float32),
            grid=(batch // bb,),
            in_specs=[
                pl.BlockSpec((n_steps + 2, bb, PAD), lambda i: (0, i, 0)),
                pl.BlockSpec((NW, PAD, PAD), lambda i: (0, 0, 0)),
                pl.BlockSpec((nb_tot, bb, PAD), lambda i: (0, 0, 0)),
            ],
            out_specs=pl.BlockSpec((bb, ACTION_DIM), lambda i: (i, 0)),
            compiler_params=pltpu.CompilerParams(
                dimension_semantics=("parallel",)),
        )(acts, w_slab, b_slab)

    return jax.jit(fwd)


# ---- glue: schedule, embeddings, parameters, weight folding -------------------
def make_schedule(n_timesteps, beta_schedule="linear"):
    if beta_schedule == "linear":
        betas = np.linspace(1e-4, 2e-2, n_timesteps, dtype=np.float64)
    else:
        # TODO(synk): other beta schedules ('vp', 'cosine') not implemented.
        raise NotImplementedError(beta_schedule)
    alphas = 1.0 - betas
    ac = np.cumprod(alphas)
    ac_prev = np.concatenate([[1.0], ac[:-1]])
    post_var = betas * (1.0 - ac_prev) / (1.0 - ac)
    return {
        "sqrt_recip_ac": np.sqrt(1.0 / ac),
        "sqrt_recipm1_ac": np.sqrt(1.0 / ac - 1.0),
        "coef1": betas * np.sqrt(ac_prev) / (1.0 - ac),
        "coef2": (1.0 - ac_prev) * np.sqrt(alphas) / (1.0 - ac),
        "log_var": np.log(np.clip(post_var, 1e-20, None)),
    }


def sinusoidal_emb(t, dim=T_EMB_DIM):
    half = dim // 2
    freqs = np.exp(-math.log(10000.0) * np.arange(half) / (half - 1))
    arg = t * freqs
    emb = np.concatenate([np.sin(arg), np.cos(arg)])[None, :]
    return jnp.asarray(emb, dtype=jnp.float32)


def init_params(key):
    def lin(k, fi, fo):
        kw, kb = jax.random.split(k)
        s = 1.0 / math.sqrt(fi)
        return (jax.random.uniform(kw, (fi, fo), jnp.float32, -s, s),
                jax.random.uniform(kb, (1, fo), jnp.float32, -s, s))

    def mlp(k, in_dim, out_dim):
        k1, k2, k3 = jax.random.split(k, 3)
        w1, b1 = lin(k1, in_dim, HIDDEN)
        w2, b2 = lin(k2, HIDDEN, HIDDEN)
        w3, b3 = lin(k3, HIDDEN, out_dim)
        return dict(w1=w1, b1=b1, w2=w2, b2=b2, w3=w3, b3=b3)

    keys = jax.random.split(key, 5)
    params = {}
    params["wrist"] = mlp(keys[0], STATE_DIM, WRIST_DIM)
    params["wrist_emb_w"], params["wrist_emb_b"] = lin(keys[1], WRIST_DIM, STATE_DIM)
    params["sustain"] = mlp(keys[2], STATE_DIM, SUSTAIN_DIM)
    params["finger_emb_w"], params["finger_emb_b"] = lin(keys[3], FINGER_DIM, STATE_DIM)

    k4, k5, k6, k7, k8, k9 = jax.random.split(keys[4], 6)
    tw1, tb1 = lin(k4, T_EMB_DIM, 2 * T_EMB_DIM)
    tw2, tb2 = lin(k5, 2 * T_EMB_DIM, T_EMB_DIM)
    in_dim = FINGER_DIM + T_EMB_DIM + STATE_DIM
    w1, b1 = lin(k6, in_dim, HIDDEN)      # fan-in matches the concatenated input
    w2, b2 = lin(k7, HIDDEN, HIDDEN)
    w3, b3 = lin(k8, HIDDEN, HIDDEN)
    w4, b4 = lin(k9, HIDDEN, FINGER_DIM)
    params["finger"] = dict(
        tw1=tw1, tb1=tb1, tw2=tw2, tb2=tb2,
        w1x=w1[:FINGER_DIM],
        w1t=w1[FINGER_DIM:FINGER_DIM + T_EMB_DIM],
        w1s=w1[FINGER_DIM + T_EMB_DIM:],
        b1=b1, w2=w2, b2=b2, w3=w3, b3=b3, w4=w4, b4=b4)
    return params


def prepare_actor(params, sched, eval_mode=False, batch_block=BATCH_BLOCK):
    """Fold action_postprocessing + time-embedding MLP into the weights and
    pack everything into two slabs (bf16 weights, f32 pre-broadcast biases)."""
    fp = params["finger"]

    # 0/1 permutation matrices (host-only; fold is exact)
    pw = np.zeros((WRIST_DIM, ACTION_DIM), np.float32)
    pf = np.zeros((FINGER_DIM, ACTION_DIM), np.float32)
    ps = np.zeros((SUSTAIN_DIM, ACTION_DIM), np.float32)
    pw[np.arange(WRIST_DIM), WRIST_COLS] = 1.0
    pf[np.arange(FINGER_DIM), FINGER_COLS] = 1.0
    ps[0, SUSTAIN_COL] = 1.0

    def npf(x):
        return np.asarray(x, dtype=np.float32)

    def pad_mat(m):
        m = npf(m)
        out = np.zeros((PAD, PAD), np.float32)
        out[: m.shape[0], : m.shape[1]] = m
        return out

    def pad_bias(b):
        b = npf(b).reshape(-1)
        row = np.zeros((PAD,), np.float32)
        row[: b.shape[0]] = b
        return np.broadcast_to(row, (batch_block, PAD)).copy()

    w, s = params["wrist"], params["sustain"]
    w_mats = [
        pad_mat(w["w1"]), pad_mat(w["w2"]), pad_mat(npf(w["w3"]) @ pw),
        pad_mat(pw.T @ npf(params["wrist_emb_w"])),
        pad_mat(pf.T @ npf(fp["w1x"])), pad_mat(fp["w1s"]),
        pad_mat(fp["w2"]), pad_mat(fp["w3"]), pad_mat(npf(fp["w4"]) @ pf),
        pad_mat(pf.T @ npf(params["finger_emb_w"])),
        pad_mat(s["w1"]), pad_mat(s["w2"]), pad_mat(npf(s["w3"]) @ ps),
    ]
    assert len(w_mats) == NW
    w_slab = jnp.asarray(np.stack(w_mats), dtype=jnp.bfloat16)   # [13, 64, 64]

    biases = [
        pad_bias(w["b1"]), pad_bias(w["b2"]), pad_bias(npf(w["b3"]) @ pw),
        pad_bias(params["wrist_emb_b"]),
        pad_bias(fp["b2"]), pad_bias(fp["b3"]), pad_bias(npf(fp["b4"]) @ pf),
        pad_bias(params["finger_emb_b"]),
        pad_bias(s["b1"]), pad_bias(s["b2"]), pad_bias(npf(s["b3"]) @ ps),
    ]
    assert len(biases) == NB

    # fold the batch-independent time-embedding MLP into a per-step bias row
    consts = []
    for step in range(N_TIMESTEPS):
        t = N_TIMESTEPS - 1 - step                           # reverse-time order
        temb = sinusoidal_emb(float(t))
        tp = _mish_exact(jnp.dot(temb, fp["tw1"], precision=HIGHEST) + fp["tb1"])
        tp = jnp.dot(tp, fp["tw2"], precision=HIGHEST) + fp["tb2"]
        row = jnp.dot(tp, fp["w1t"], precision=HIGHEST) + fp["b1"]
        biases.append(pad_bias(row))
        nonzero = 0.0 if (t == 0 or eval_mode) else 1.0
        consts += [float(sched["sqrt_recip_ac"][t]),
                   float(sched["sqrt_recipm1_ac"][t]),
                   float(sched["coef1"][t]),
                   float(sched["coef2"][t]),
                   nonzero * NOISE_RATIO * math.exp(0.5 * float(sched["log_var"][t]))]

    b_slab = jnp.asarray(np.stack(biases), dtype=jnp.float32)    # [11+T, BB, 64]
    return consts, w_slab, b_slab


# ---- pure-JAX reference (unfused, unfolded, f32 HIGHEST) for validation -------
def actor_forward_ref(params, state, x_init, step_noise, sched, eval_mode=False):
    def dot(a, b):
        return jnp.dot(a, b, precision=HIGHEST)

    def mlp(x, p):
        h = _mish_exact(dot(x, p["w1"]) + p["b1"])
        h = _mish_exact(dot(h, p["w2"]) + p["b2"])
        return jnp.tanh(dot(h, p["w3"]) + p["b3"])

    a_wrist = mlp(state, params["wrist"])
    wrist_emb = dot(a_wrist, params["wrist_emb_w"]) + params["wrist_emb_b"]
    s = state + wrist_emb
    fp = params["finger"]
    x = x_init
    for i, t in enumerate(reversed(range(N_TIMESTEPS))):
        temb = sinusoidal_emb(float(t))
        tp = _mish_exact(dot(temb, fp["tw1"]) + fp["tb1"])
        tp = dot(tp, fp["tw2"]) + fp["tb2"]
        h = _mish_exact(dot(x, fp["w1x"]) + dot(tp, fp["w1t"])
                        + dot(s, fp["w1s"]) + fp["b1"])
        h = _mish_exact(dot(h, fp["w2"]) + fp["b2"])
        h = _mish_exact(dot(h, fp["w3"]) + fp["b3"])
        eps = dot(h, fp["w4"]) + fp["b4"]
        x_recon = jnp.clip(float(sched["sqrt_recip_ac"][t]) * x
                           - float(sched["sqrt_recipm1_ac"][t]) * eps, -1.0, 1.0)
        nonzero = 0.0 if (t == 0 or eval_mode) else 1.0
        ns = nonzero * NOISE_RATIO * math.exp(0.5 * float(sched["log_var"][t]))
        x = (float(sched["coef1"][t]) * x_recon + float(sched["coef2"][t]) * x
             + ns * step_noise[i])
    a_finger = jnp.clip(x, -1.0, 1.0)
    finger_emb = dot(a_finger, params["finger_emb_w"]) + params["finger_emb_b"]
    a_sustain = mlp(state + wrist_emb + finger_emb, params["sustain"])
    return jnp.concatenate([a_wrist[:, :4], a_finger[:, :18],
                            a_wrist[:, 4:], a_finger[:, 18:], a_sustain], axis=1)


if __name__ == "__main__":
    key = jax.random.PRNGKey(0)
    kp, ks, kx, kn = jax.random.split(key, 4)

    params = init_params(kp)
    sched = make_schedule(N_TIMESTEPS, "linear")

    state = jax.random.normal(ks, (BATCH, STATE_DIM), jnp.float32)
    # diffusion randomness generated in JAX glue so the kernel is deterministic
    x_init = jax.random.normal(kx, (BATCH, FINGER_DIM), jnp.float32)
    step_noise = jax.random.normal(kn, (N_TIMESTEPS, BATCH, FINGER_DIM), jnp.float32)

    consts, w_slab, b_slab = prepare_actor(params, sched, eval_mode=False,
                                           batch_block=BATCH_BLOCK)
    fwd = make_actor_forward(consts, batch_block=BATCH_BLOCK)
    out = fwd(w_slab, b_slab, state, x_init, step_noise)
    jax.block_until_ready(out)

    assert out.shape == (BATCH, ACTION_DIM), out.shape
    assert bool(jnp.all(jnp.isfinite(out)))
    ref = actor_forward_ref(params, state, x_init, step_noise, sched, eval_mode=False)
    # tolerance accounts for bf16 matmul inputs + approx-reciprocal mish
    np.testing.assert_allclose(np.asarray(out), np.asarray(ref), rtol=3e-2, atol=3e-2)
    print("KERNEL_OK")
</pallas_src>

<mosaic_0001>
module attributes {stable_mosaic.version = 11 : i64} {
  func.func @kernel(%arg0: i32, %arg1: memref<7x8x64xf32, #tpu.memory_space<vmem>>, %arg2: memref<13x64x64xbf16, #tpu.memory_space<vmem>>, %arg3: memref<16x8x64xf32, #tpu.memory_space<vmem>>, %arg4: memref<8x45xf32, #tpu.memory_space<vmem>>) attributes {dimension_semantics = [#tpu.dimension_semantics<parallel>], iteration_bounds = array<i64: 1>, scalar_prefetch = 0 : i64, scratch_operands = 0 : i64, tpu.core_type = #tpu.core_type<tc>, window_params = [{transform_indices = @transform_0, window_bounds = array<i64: 7, 8, 64>}, {pipeline_mode = #tpu.pipeline_mode<synchronous>, transform_indices = @transform_1, window_bounds = array<i64: 13, 64, 64>}, {pipeline_mode = #tpu.pipeline_mode<synchronous>, transform_indices = @transform_2, window_bounds = array<i64: 16, 8, 64>}, {transform_indices = @transform_3, window_bounds = array<i64: 8, 45>}]} {
    %c0 = arith.constant 0 : index
    %c0_0 = arith.constant 0 : index
    %c0_1 = arith.constant 0 : index
    %0 = vector.load %arg1[%c0, %c0_0, %c0_1] : memref<7x8x64xf32, #tpu.memory_space<vmem>>, vector<1x8x64xf32>
    %1 = vector.shape_cast %0 : vector<1x8x64xf32> to vector<8x64xf32>
    %2 = arith.truncf %1 : vector<8x64xf32> to vector<8x64xbf16>
    %c0_2 = arith.constant 0 : index
    %c0_3 = arith.constant 0 : index
    %c0_4 = arith.constant 0 : index
    %3 = vector.load %arg2[%c0_2, %c0_3, %c0_4] : memref<13x64x64xbf16, #tpu.memory_space<vmem>>, vector<1x64x64xbf16>
    %4 = vector.shape_cast %3 : vector<1x64x64xbf16> to vector<64x64xbf16>
    %cst = arith.constant dense<0.000000e+00> : vector<8x64xf32>
    %5 = tpu.matmul %2, %4, %cst {dimension_numbers = #tpu.dot_dimension_numbers<[1], [0], [0], [1], [0, 0, 1, 1], [], []>} : vector<8x64xbf16>, vector<64x64xbf16>, vector<8x64xf32> -> vector<8x64xf32>
    %c0_5 = arith.constant 0 : index
    %c0_6 = arith.constant 0 : index
    %c0_7 = arith.constant 0 : index
    %6 = vector.load %arg3[%c0_5, %c0_6, %c0_7] : memref<16x8x64xf32, #tpu.memory_space<vmem>>, vector<1x8x64xf32>
    %7 = vector.shape_cast %6 : vector<1x8x64xf32> to vector<8x64xf32>
    %8 = arith.addf %5, %7 : vector<8x64xf32>
    %cst_8 = arith.constant 2.000000e+01 : f32
    %9 = vector.broadcast %cst_8 : f32 to vector<8x64xf32>
    %10 = arith.minimumf %8, %9 : vector<8x64xf32>
    %11 = math.exp %10 : vector<8x64xf32>
    %cst_9 = arith.constant 2.000000e+00 : f32
    %12 = vector.broadcast %cst_9 : f32 to vector<8x64xf32>
    %13 = arith.addf %11, %12 : vector<8x64xf32>
    %14 = arith.mulf %11, %13 : vector<8x64xf32>
    %15 = arith.mulf %8, %14 : vector<8x64xf32>
    %cst_10 = arith.constant 2.000000e+00 : f32
    %16 = vector.broadcast %cst_10 : f32 to vector<8x64xf32>
    %17 = arith.addf %14, %16 : vector<8x64xf32>
    %18 = tpu.reciprocal %17 {approx = true} : vector<8x64xf32> -> vector<8x64xf32>
    %19 = arith.mulf %15, %18 : vector<8x64xf32>
    %20 = arith.truncf %19 : vector<8x64xf32> to vector<8x64xbf16>
    %c1 = arith.constant 1 : index
    %c0_11 = arith.constant 0 : index
    %c0_12 = arith.constant 0 : index
    %21 = vector.load %arg2[%c1, %c0_11, %c0_12] : memref<13x64x64xbf16, #tpu.memory_space<vmem>>, vector<1x64x64xbf16>
    %22 = vector.shape_cast %21 : vector<1x64x64xbf16> to vector<64x64xbf16>
    %cst_13 = arith.constant dense<0.000000e+00> : vector<8x64xf32>
    %23 = tpu.matmul %20, %22, %cst_13 {dimension_numbers = #tpu.dot_dimension_numbers<[1], [0], [0], [1], [0, 0, 1, 1], [], []>} : vector<8x64xbf16>, vector<64x64xbf16>, vector<8x64xf32> -> vector<8x64xf32>
    %c1_14 = arith.constant 1 : index
    %c0_15 = arith.constant 0 : index
    %c0_16 = arith.constant 0 : index
    %24 = vector.load %arg3[%c1_14, %c0_15, %c0_16] : memref<16x8x64xf32, #tpu.memory_space<vmem>>, vector<1x8x64xf32>
    %25 = vector.shape_cast %24 : vector<1x8x64xf32> to vector<8x64xf32>
    %26 = arith.addf %23, %25 : vector<8x64xf32>
    %cst_17 = arith.constant 2.000000e+01 : f32
    %27 = vector.broadcast %cst_17 : f32 to vector<8x64xf32>
    %28 = arith.minimumf %26, %27 : vector<8x64xf32>
    %29 = math.exp %28 : vector<8x64xf32>
    %cst_18 = arith.constant 2.000000e+00 : f32
    %30 = vector.broadcast %cst_18 : f32 to vector<8x64xf32>
    %31 = arith.addf %29, %30 : vector<8x64xf32>
    %32 = arith.mulf %29, %31 : vector<8x64xf32>
    %33 = arith.mulf %26, %32 : vector<8x64xf32>
    %cst_19 = arith.constant 2.000000e+00 : f32
    %34 = vector.broadcast %cst_19 : f32 to vector<8x64xf32>
    %35 = arith.addf %32, %34 : vector<8x64xf32>
    %36 = tpu.reciprocal %35 {approx = true} : vector<8x64xf32> -> vector<8x64xf32>
    %37 = arith.mulf %33, %36 : vector<8x64xf32>
    %38 = arith.truncf %37 : vector<8x64xf32> to vector<8x64xbf16>
    %c2 = arith.constant 2 : index
    %c0_20 = arith.constant 0 : index
    %c0_21 = arith.constant 0 : index
    %39 = vector.load %arg2[%c2, %c0_20, %c0_21] : memref<13x64x64xbf16, #tpu.memory_space<vmem>>, vector<1x64x64xbf16>
    %40 = vector.shape_cast %39 : vector<1x64x64xbf16> to vector<64x64xbf16>
    %cst_22 = arith.constant dense<0.000000e+00> : vector<8x64xf32>
    %41 = tpu.matmul %38, %40, %cst_22 {dimension_numbers = #tpu.dot_dimension_numbers<[1], [0], [0], [1], [0, 0, 1, 1], [], []>} : vector<8x64xbf16>, vector<64x64xbf16>, vector<8x64xf32> -> vector<8x64xf32>
    %c2_23 = arith.constant 2 : index
    %c0_24 = arith.constant 0 : index
    %c0_25 = arith.constant 0 : index
    %42 = vector.load %arg3[%c2_23, %c0_24, %c0_25] : memref<16x8x64xf32, #tpu.memory_space<vmem>>, vector<1x8x64xf32>
    %43 = vector.shape_cast %42 : vector<1x8x64xf32> to vector<8x64xf32>
    %44 = arith.addf %41, %43 : vector<8x64xf32>
    %45 = math.tanh %44 : vector<8x64xf32>
    %46 = arith.truncf %45 : vector<8x64xf32> to vector<8x64xbf16>
    %c3 = arith.constant 3 : index
    %c0_26 = arith.constant 0 : index
    %c0_27 = arith.constant 0 : index
    %47 = vector.load %arg2[%c3, %c0_26, %c0_27] : memref<13x64x64xbf16, #tpu.memory_space<vmem>>, vector<1x64x64xbf16>
    %48 = vector.shape_cast %47 : vector<1x64x64xbf16> to vector<64x64xbf16>
    %cst_28 = arith.constant dense<0.000000e+00> : vector<8x64xf32>
    %49 = tpu.matmul %46, %48, %cst_28 {dimension_numbers = #tpu.dot_dimension_numbers<[1], [0], [0], [1], [0, 0, 1, 1], [], []>} : vector<8x64xbf16>, vector<64x64xbf16>, vector<8x64xf32> -> vector<8x64xf32>
    %c3_29 = arith.constant 3 : index
    %c0_30 = arith.constant 0 : index
    %c0_31 = arith.constant 0 : index
    %50 = vector.load %arg3[%c3_29, %c0_30, %c0_31] : memref<16x8x64xf32, #tpu.memory_space<vmem>>, vector<1x8x64xf32>
    %51 = vector.shape_cast %50 : vector<1x8x64xf32> to vector<8x64xf32>
    %52 = arith.addf %49, %51 : vector<8x64xf32>
    %53 = arith.addf %1, %52 : vector<8x64xf32>
    %54 = arith.truncf %53 : vector<8x64xf32> to vector<8x64xbf16>
    %c5 = arith.constant 5 : index
    %c0_32 = arith.constant 0 : index
    %c0_33 = arith.constant 0 : index
    %55 = vector.load %arg2[%c5, %c0_32, %c0_33] : memref<13x64x64xbf16, #tpu.memory_space<vmem>>, vector<1x64x64xbf16>
    %56 = vector.shape_cast %55 : vector<1x64x64xbf16> to vector<64x64xbf16>
    %cst_34 = arith.constant dense<0.000000e+00> : vector<8x64xf32>
    %57 = tpu.matmul %54, %56, %cst_34 {dimension_numbers = #tpu.dot_dimension_numbers<[1], [0], [0], [1], [0, 0, 1, 1], [], []>} : vector<8x64xbf16>, vector<64x64xbf16>, vector<8x64xf32> -> vector<8x64xf32>
    %c1_35 = arith.constant 1 : index
    %c0_36 = arith.constant 0 : index
    %c0_37 = arith.constant 0 : index
    %58 = vector.load %arg1[%c1_35, %c0_36, %c0_37] : memref<7x8x64xf32, #tpu.memory_space<vmem>>, vector<1x8x64xf32>
    %59 = vector.shape_cast %58 : vector<1x8x64xf32> to vector<8x64xf32>
    %60 = arith.truncf %59 : vector<8x64xf32> to vector<8x64xbf16>
    %c4 = arith.constant 4 : index
    %c0_38 = arith.constant 0 : index
    %c0_39 = arith.constant 0 : index
    %61 = vector.load %arg2[%c4, %c0_38, %c0_39] : memref<13x64x64xbf16, #tpu.memory_space<vmem>>, vector<1x64x64xbf16>
    %62 = vector.shape_cast %61 : vector<1x64x64xbf16> to vector<64x64xbf16>
    %cst_40 = arith.constant dense<0.000000e+00> : vector<8x64xf32>
    %63 = tpu.matmul %60, %62, %cst_40 {dimension_numbers = #tpu.dot_dimension_numbers<[1], [0], [0], [1], [0, 0, 1, 1], [], []>} : vector<8x64xbf16>, vector<64x64xbf16>, vector<8x64xf32> -> vector<8x64xf32>
    %64 = arith.addf %63, %57 : vector<8x64xf32>
    %c11 = arith.constant 11 : index
    %c0_41 = arith.constant 0 : index
    %c0_42 = arith.constant 0 : index
    %65 = vector.load %arg3[%c11, %c0_41, %c0_42] : memref<16x8x64xf32, #tpu.memory_space<vmem>>, vector<1x8x64xf32>
    %66 = vector.shape_cast %65 : vector<1x8x64xf32> to vector<8x64xf32>
    %67 = arith.addf %64, %66 : vector<8x64xf32>
    %cst_43 = arith.constant 2.000000e+01 : f32
    %68 = vector.broadcast %cst_43 : f32 to vector<8x64xf32>
    %69 = arith.minimumf %67, %68 : vector<8x64xf32>
    %70 = math.exp %69 : vector<8x64xf32>
    %cst_44 = arith.constant 2.000000e+00 : f32
    %71 = vector.broadcast %cst_44 : f32 to vector<8x64xf32>
    %72 = arith.addf %70, %71 : vector<8x64xf32>
    %73 = arith.mulf %70, %72 : vector<8x64xf32>
    %74 = arith.mulf %67, %73 : vector<8x64xf32>
    %cst_45 = arith.constant 2.000000e+00 : f32
    %75 = vector.broadcast %cst_45 : f32 to vector<8x64xf32>
    %76 = arith.addf %73, %75 : vector<8x64xf32>
    %77 = tpu.reciprocal %76 {approx = true} : vector<8x64xf32> -> vector<8x64xf32>
    %78 = arith.mulf %74, %77 : vector<8x64xf32>
    %79 = arith.truncf %78 : vector<8x64xf32> to vector<8x64xbf16>
    %c6 = arith.constant 6 : index
    %c0_46 = arith.constant 0 : index
    %c0_47 = arith.constant 0 : index
    %80 = vector.load %arg2[%c6, %c0_46, %c0_47] : memref<13x64x64xbf16, #tpu.memory_space<vmem>>, vector<1x64x64xbf16>
    %81 = vector.shape_cast %80 : vector<1x64x64xbf16> to vector<64x64xbf16>
    %cst_48 = arith.constant dense<0.000000e+00> : vector<8x64xf32>
    %82 = tpu.matmul %79, %81, %cst_48 {dimension_numbers = #tpu.dot_dimension_numbers<[1], [0], [0], [1], [0, 0, 1, 1], [], []>} : vector<8x64xbf16>, vector<64x64xbf16>, vector<8x64xf32> -> vector<8x64xf32>
    %c4_49 = arith.constant 4 : index
    %c0_50 = arith.constant 0 : index
    %c0_51 = arith.constant 0 : index
    %83 = vector.load %arg3[%c4_49, %c0_50, %c0_51] : memref<16x8x64xf32, #tpu.memory_space<vmem>>, vector<1x8x64xf32>
    %84 = vector.shape_cast %83 : vector<1x8x64xf32> to vector<8x64xf32>
    %85 = arith.addf %82, %84 : vector<8x64xf32>
    %cst_52 = arith.constant 2.000000e+01 : f32
    %86 = vector.broadcast %cst_52 : f32 to vector<8x64xf32>
    %87 = arith.minimumf %85, %86 : vector<8x64xf32>
    %88 = math.exp %87 : vector<8x64xf32>
    %cst_53 = arith.constant 2.000000e+00 : f32
    %89 = vector.broadcast %cst_53 : f32 to vector<8x64xf32>
    %90 = arith.addf %88, %89 : vector<8x64xf32>
    %91 = arith.mulf %88, %90 : vector<8x64xf32>
    %92 = arith.mulf %85, %91 : vector<8x64xf32>
    %cst_54 = arith.constant 2.000000e+00 : f32
    %93 = vector.broadcast %cst_54 : f32 to vector<8x64xf32>
    %94 = arith.addf %91, %93 : vector<8x64xf32>
    %95 = tpu.reciprocal %94 {approx = true} : vector<8x64xf32> -> vector<8x64xf32>
    %96 = arith.mulf %92, %95 : vector<8x64xf32>
    %97 = arith.truncf %96 : vector<8x64xf32> to vector<8x64xbf16>
    %c7 = arith.constant 7 : index
    %c0_55 = arith.constant 0 : index
    %c0_56 = arith.constant 0 : index
    %98 = vector.load %arg2[%c7, %c0_55, %c0_56] : memref<13x64x64xbf16, #tpu.memory_space<vmem>>, vector<1x64x64xbf16>
    %99 = vector.shape_cast %98 : vector<1x64x64xbf16> to vector<64x64xbf16>
    %cst_57 = arith.constant dense<0.000000e+00> : vector<8x64xf32>
    %100 = tpu.matmul %97, %99, %cst_57 {dimension_numbers = #tpu.dot_dimension_numbers<[1], [0], [0], [1], [0, 0, 1, 1], [], []>} : vector<8x64xbf16>, vector<64x64xbf16>, vector<8x64xf32> -> vector<8x64xf32>
    %c5_58 = arith.constant 5 : index
    %c0_59 = arith.constant 0 : index
    %c0_60 = arith.constant 0 : index
    %101 = vector.load %arg3[%c5_58, %c0_59, %c0_60] : memref<16x8x64xf32, #tpu.memory_space<vmem>>, vector<1x8x64xf32>
    %102 = vector.shape_cast %101 : vector<1x8x64xf32> to vector<8x64xf32>
    %103 = arith.addf %100, %102 : vector<8x64xf32>
    %cst_61 = arith.constant 2.000000e+01 : f32
    %104 = vector.broadcast %cst_61 : f32 to vector<8x64xf32>
    %105 = arith.minimumf %103, %104 : vector<8x64xf32>
    %106 = math.exp %105 : vector<8x64xf32>
    %cst_62 = arith.constant 2.000000e+00 : f32
    %107 = vector.broadcast %cst_62 : f32 to vector<8x64xf32>
    %108 = arith.addf %106, %107 : vector<8x64xf32>
    %109 = arith.mulf %106, %108 : vector<8x64xf32>
    %110 = arith.mulf %103, %109 : vector<8x64xf32>
    %cst_63 = arith.constant 2.000000e+00 : f32
    %111 = vector.broadcast %cst_63 : f32 to vector<8x64xf32>
    %112 = arith.addf %109, %111 : vector<8x64xf32>
    %113 = tpu.reciprocal %112 {approx = true} : vector<8x64xf32> -> vector<8x64xf32>
    %114 = arith.mulf %110, %113 : vector<8x64xf32>
    %115 = arith.truncf %114 : vector<8x64xf32> to vector<8x64xbf16>
    %c8 = arith.constant 8 : index
    %c0_64 = arith.constant 0 : index
    %c0_65 = arith.constant 0 : index
    %116 = vector.load %arg2[%c8, %c0_64, %c0_65] : memref<13x64x64xbf16, #tpu.memory_space<vmem>>, vector<1x64x64xbf16>
    %117 = vector.shape_cast %116 : vector<1x64x64xbf16> to vector<64x64xbf16>
    %cst_66 = arith.constant dense<0.000000e+00> : vector<8x64xf32>
    %118 = tpu.matmul %115, %117, %cst_66 {dimension_numbers = #tpu.dot_dimension_numbers<[1], [0], [0], [1], [0, 0, 1, 1], [], []>} : vector<8x64xbf16>, vector<64x64xbf16>, vector<8x64xf32> -> vector<8x64xf32>
    %c6_67 = arith.constant 6 : index
    %c0_68 = arith.constant 0 : index
    %c0_69 = arith.constant 0 : index
    %119 = vector.load %arg3[%c6_67, %c0_68, %c0_69] : memref<16x8x64xf32, #tpu.memory_space<vmem>>, vector<1x8x64xf32>
    %120 = vector.shape_cast %119 : vector<1x8x64xf32> to vector<8x64xf32>
    %121 = arith.addf %118, %120 : vector<8x64xf32>
    %cst_70 = arith.constant 1.02563834 : f32
    %122 = vector.broadcast %cst_70 : f32 to vector<8x64xf32>
    %123 = arith.mulf %122, %59 : vector<8x64xf32>
    %cst_71 = arith.constant 0.227890596 : f32
    %124 = vector.broadcast %cst_71 : f32 to vector<8x64xf32>
    %125 = arith.mulf %124, %121 : vector<8x64xf32>
    %126 = arith.subf %123, %125 : vector<8x64xf32>
    %cst_72 = arith.constant -1.000000e+00 : f32
    %cst_73 = arith.constant 1.000000e+00 : f32
    %127 = vector.broadcast %cst_72 : f32 to vector<8x64xf32>
    %128 = arith.maximumf %127, %126 : vector<8x64xf32>
    %129 = vector.broadcast %cst_73 : f32 to vector<8x64xf32>
    %130 = arith.minimumf %129, %128 : vector<8x64xf32>
    %cst_74 = arith.constant 0.398986667 : f32
    %131 = vector.broadcast %cst_74 : f32 to vector<8x64xf32>
    %132 = arith.mulf %131, %130 : vector<8x64xf32>
    %cst_75 = arith.constant 0.600936472 : f32
    %133 = vector.broadcast %cst_75 : f32 to vector<8x64xf32>
    %134 = arith.mulf %133, %59 : vector<8x64xf32>
    %135 = arith.addf %132, %134 : vector<8x64xf32>
    %c2_76 = arith.constant 2 : index
    %c0_77 = arith.constant 0 : index
    %c0_78 = arith.constant 0 : index
    %136 = vector.load %arg1[%c2_76, %c0_77, %c0_78] : memref<7x8x64xf32, #tpu.memory_space<vmem>>, vector<1x8x64xf32>
    %137 = vector.shape_cast %136 : vector<1x8x64xf32> to vector<8x64xf32>
    %cst_79 = arith.constant 0.0110185072 : f32
    %138 = vector.broadcast %cst_79 : f32 to vector<8x64xf32>
    %139 = arith.mulf %138, %137 : vector<8x64xf32>
    %140 = arith.addf %135, %139 : vector<8x64xf32>
    %141 = arith.truncf %140 : vector<8x64xf32> to vector<8x64xbf16>
    %c4_80 = arith.constant 4 : index
    %c0_81 = arith.constant 0 : index
    %c0_82 = arith.constant 0 : index
    %142 = vector.load %arg2[%c4_80, %c0_81, %c0_82] : memref<13x64x64xbf16, #tpu.memory_space<vmem>>, vector<1x64x64xbf16>
    %143 = vector.shape_cast %142 : vector<1x64x64xbf16> to vector<64x64xbf16>
    %cst_83 = arith.constant dense<0.000000e+00> : vector<8x64xf32>
    %144 = tpu.matmul %141, %143, %cst_83 {dimension_numbers = #tpu.dot_dimension_numbers<[1], [0], [0], [1], [0, 0, 1, 1], [], []>} : vector<8x64xbf16>, vector<64x64xbf16>, vector<8x64xf32> -> vector<8x64xf32>
    %145 = arith.addf %144, %57 : vector<8x64xf32>
    %c12 = arith.constant 12 : index
    %c0_84 = arith.constant 0 : index
    %c0_85 = arith.constant 0 : index
    %146 = vector.load %arg3[%c12, %c0_84, %c0_85] : memref<16x8x64xf32, #tpu.memory_space<vmem>>, vector<1x8x64xf32>
    %147 = vector.shape_cast %146 : vector<1x8x64xf32> to vector<8x64xf32>
    %148 = arith.addf %145, %147 : vector<8x64xf32>
    %cst_86 = arith.constant 2.000000e+01 : f32
    %149 = vector.broadcast %cst_86 : f32 to vector<8x64xf32>
    %150 = arith.minimumf %148, %149 : vector<8x64xf32>
    %151 = math.exp %150 : vector<8x64xf32>
    %cst_87 = arith.constant 2.000000e+00 : f32
    %152 = vector.broadcast %cst_87 : f32 to vector<8x64xf32>
    %153 = arith.addf %151, %152 : vector<8x64xf32>
    %154 = arith.mulf %151, %153 : vector<8x64xf32>
    %155 = arith.mulf %148, %154 : vector<8x64xf32>
    %cst_88 = arith.constant 2.000000e+00 : f32
    %156 = vector.broadcast %cst_88 : f32 to vector<8x64xf32>
    %157 = arith.addf %154, %156 : vector<8x64xf32>
    %158 = tpu.reciprocal %157 {approx = true} : vector<8x64xf32> -> vector<8x64xf32>
    %159 = arith.mulf %155, %158 : vector<8x64xf32>
    %160 = arith.truncf %159 : vector<8x64xf32> to vector<8x64xbf16>
    %c6_89 = arith.constant 6 : index
    %c0_90 = arith.constant 0 : index
    %c0_91 = arith.constant 0 : index
    %161 = vector.load %arg2[%c6_89, %c0_90, %c0_91] : memref<13x64x64xbf16, #tpu.memory_space<vmem>>, vector<1x64x64xbf16>
    %162 = vector.shape_cast %161 : vector<1x64x64xbf16> to vector<64x64xbf16>
    %cst_92 = arith.constant dense<0.000000e+00> : vector<8x64xf32>
    %163 = tpu.matmul %160, %162, %cst_92 {dimension_numbers = #tpu.dot_dimension_numbers<[1], [0], [0], [1], [0, 0, 1, 1], [], []>} : vector<8x64xbf16>, vector<64x64xbf16>, vector<8x64xf32> -> vector<8x64xf32>
    %c4_93 = arith.constant 4 : index
    %c0_94 = arith.constant 0 : index
    %c0_95 = arith.constant 0 : index
    %164 = vector.load %arg3[%c4_93, %c0_94, %c0_95] : memref<16x8x64xf32, #tpu.memory_space<vmem>>, vector<1x8x64xf32>
    %165 = vector.shape_cast %164 : vector<1x8x64xf32> to vector<8x64xf32>
    %166 = arith.addf %163, %165 : vector<8x64xf32>
    %cst_96 = arith.constant 2.000000e+01 : f32
    %167 = vector.broadcast %cst_96 : f32 to vector<8x64xf32>
    %168 = arith.minimumf %166, %167 : vector<8x64xf32>
    %169 = math.exp %168 : vector<8x64xf32>
    %cst_97 = arith.constant 2.000000e+00 : f32
    %170 = vector.broadcast %cst_97 : f32 to vector<8x64xf32>
    %171 = arith.addf %169, %170 : vector<8x64xf32>
    %172 = arith.mulf %169, %171 : vector<8x64xf32>
    %173 = arith.mulf %166, %172 : vector<8x64xf32>
    %cst_98 = arith.constant 2.000000e+00 : f32
    %174 = vector.broadcast %cst_98 : f32 to vector<8x64xf32>
    %175 = arith.addf %172, %174 : vector<8x64xf32>
    %176 = tpu.reciprocal %175 {approx = true} : vector<8x64xf32> -> vector<8x64xf32>
    %177 = arith.mulf %173, %176 : vector<8x64xf32>
    %178 = arith.truncf %177 : vector<8x64xf32> to vector<8x64xbf16>
    %c7_99 = arith.constant 7 : index
    %c0_100 = arith.constant 0 : index
    %c0_101 = arith.constant 0 : index
    %179 = vector.load %arg2[%c7_99, %c0_100, %c0_101] : memref<13x64x64xbf16, #tpu.memory_space<vmem>>, vector<1x64x64xbf16>
    %180 = vector.shape_cast %179 : vector<1x64x64xbf16> to vector<64x64xbf16>
    %cst_102 = arith.constant dense<0.000000e+00> : vector<8x64xf32>
    %181 = tpu.matmul %178, %180, %cst_102 {dimension_numbers = #tpu.dot_dimension_numbers<[1], [0], [0], [1], [0, 0, 1, 1], [], []>} : vector<8x64xbf16>, vector<64x64xbf16>, vector<8x64xf32> -> vector<8x64xf32>
    %c5_103 = arith.constant 5 : index
    %c0_104 = arith.constant 0 : index
    %c0_105 = arith.constant 0 : index
    %182 = vector.load %arg3[%c5_103, %c0_104, %c0_105] : memref<16x8x64xf32, #tpu.memory_space<vmem>>, vector<1x8x64xf32>
    %183 = vector.shape_cast %182 : vector<1x8x64xf32> to vector<8x64xf32>
    %184 = arith.addf %181, %183 : vector<8x64xf32>
    %cst_106 = arith.constant 2.000000e+01 : f32
    %185 = vector.broadcast %cst_106 : f32 to vector<8x64xf32>
    %186 = arith.minimumf %184, %185 : vector<8x64xf32>
    %187 = math.exp %186 : vector<8x64xf32>
    %cst_107 = arith.constant 2.000000e+00 : f32
    %188 = vector.broadcast %cst_107 : f32 to vector<8x64xf32>
    %189 = arith.addf %187, %188 : vector<8x64xf32>
    %190 = arith.mulf %187, %189 : vector<8x64xf32>
    %191 = arith.mulf %184, %190 : vector<8x64xf32>
    %cst_108 = arith.constant 2.000000e+00 : f32
    %192 = vector.broadcast %cst_108 : f32 to vector<8x64xf32>
    %193 = arith.addf %190, %192 : vector<8x64xf32>
    %194 = tpu.reciprocal %193 {approx = true} : vector<8x64xf32> -> vector<8x64xf32>
    %195 = arith.mulf %191, %194 : vector<8x64xf32>
    %196 = arith.truncf %195 : vector<8x64xf32> to vector<8x64xbf16>
    %c8_109 = arith.constant 8 : index
    %c0_110 = arith.constant 0 : index
    %c0_111 = arith.constant 0 : index
    %197 = vector.load %arg2[%c8_109, %c0_110, %c0_111] : memref<13x64x64xbf16, #tpu.memory_space<vmem>>, vector<1x64x64xbf16>
    %198 = vector.shape_cast %197 : vector<1x64x64xbf16> to vector<64x64xbf16>
    %cst_112 = arith.constant dense<0.000000e+00> : vector<8x64xf32>
    %199 = tpu.matmul %196, %198, %cst_112 {dimension_numbers = #tpu.dot_dimension_numbers<[1], [0], [0], [1], [0, 0, 1, 1], [], []>} : vector<8x64xbf16>, vector<64x64xbf16>, vector<8x64xf32> -> vector<8x64xf32>
    %c6_113 = arith.constant 6 : index
    %c0_114 = arith.constant 0 : index
    %c0_115 = arith.constant 0 : index
    %200 = vector.load %arg3[%c6_113, %c0_114, %c0_115] : memref<16x8x64xf32, #tpu.memory_space<vmem>>, vector<1x8x64xf32>
    %201 = vector.shape_cast %200 : vector<1x8x64xf32> to vector<8x64xf32>
    %202 = arith.addf %199, %201 : vector<8x64xf32>
    %cst_116 = arith.constant 1.0153302 : f32
    %203 = vector.broadcast %cst_116 : f32 to vector<8x64xf32>
    %204 = arith.mulf %203, %140 : vector<8x64xf32>
    %cst_117 = arith.constant 1.757710e-01 : f32
    %205 = vector.broadcast %cst_117 : f32 to vector<8x64xf32>
    %206 = arith.mulf %205, %202 : vector<8x64xf32>
    %207 = arith.subf %204, %206 : vector<8x64xf32>
    %cst_118 = arith.constant -1.000000e+00 : f32
    %cst_119 = arith.constant 1.000000e+00 : f32
    %208 = vector.broadcast %cst_118 : f32 to vector<8x64xf32>
    %209 = arith.maximumf %208, %207 : vector<8x64xf32>
    %210 = vector.broadcast %cst_119 : f32 to vector<8x64xf32>
    %211 = arith.minimumf %210, %209 : vector<8x64xf32>
    %cst_120 = arith.constant 0.497524828 : f32
    %212 = vector.broadcast %cst_120 : f32 to vector<8x64xf32>
    %213 = arith.mulf %212, %211 : vector<8x64xf32>
    %cst_121 = arith.constant 0.502446234 : f32
    %214 = vector.broadcast %cst_121 : f32 to vector<8x64xf32>
    %215 = arith.mulf %214, %140 : vector<8x64xf32>
    %216 = arith.addf %213, %215 : vector<8x64xf32>
    %c3_122 = arith.constant 3 : index
    %c0_123 = arith.constant 0 : index
    %c0_124 = arith.constant 0 : index
    %217 = vector.load %arg1[%c3_122, %c0_123, %c0_124] : memref<7x8x64xf32, #tpu.memory_space<vmem>>, vector<1x8x64xf32>
    %218 = vector.shape_cast %217 : vector<1x8x64xf32> to vector<8x64xf32>
    %cst_125 = arith.constant 0.0087215919 : f32
    %219 = vector.broadcast %cst_125 : f32 to vector<8x64xf32>
    %220 = arith.mulf %219, %218 : vector<8x64xf32>
    %221 = arith.addf %216, %220 : vector<8x64xf32>
    %222 = arith.truncf %221 : vector<8x64xf32> to vector<8x64xbf16>
    %c4_126 = arith.constant 4 : index
    %c0_127 = arith.constant 0 : index
    %c0_128 = arith.constant 0 : index
    %223 = vector.load %arg2[%c4_126, %c0_127, %c0_128] : memref<13x64x64xbf16, #tpu.memory_space<vmem>>, vector<1x64x64xbf16>
    %224 = vector.shape_cast %223 : vector<1x64x64xbf16> to vector<64x64xbf16>
    %cst_129 = arith.constant dense<0.000000e+00> : vector<8x64xf32>
    %225 = tpu.matmul %222, %224, %cst_129 {dimension_numbers = #tpu.dot_dimension_numbers<[1], [0], [0], [1], [0, 0, 1, 1], [], []>} : vector<8x64xbf16>, vector<64x64xbf16>, vector<8x64xf32> -> vector<8x64xf32>
    %226 = arith.addf %225, %57 : vector<8x64xf32>
    %c13 = arith.constant 13 : index
    %c0_130 = arith.constant 0 : index
    %c0_131 = arith.constant 0 : index
    %227 = vector.load %arg3[%c13, %c0_130, %c0_131] : memref<16x8x64xf32, #tpu.memory_space<vmem>>, vector<1x8x64xf32>
    %228 = vector.shape_cast %227 : vector<1x8x64xf32> to vector<8x64xf32>
    %229 = arith.addf %226, %228 : vector<8x64xf32>
    %cst_132 = arith.constant 2.000000e+01 : f32
    %230 = vector.broadcast %cst_132 : f32 to vector<8x64xf32>
    %231 = arith.minimumf %229, %230 : vector<8x64xf32>
    %232 = math.exp %231 : vector<8x64xf32>
    %cst_133 = arith.constant 2.000000e+00 : f32
    %233 = vector.broadcast %cst_133 : f32 to vector<8x64xf32>
    %234 = arith.addf %232, %233 : vector<8x64xf32>
    %235 = arith.mulf %232, %234 : vector<8x64xf32>
    %236 = arith.mulf %229, %235 : vector<8x64xf32>
    %cst_134 = arith.constant 2.000000e+00 : f32
    %237 = vector.broadcast %cst_134 : f32 to vector<8x64xf32>
    %238 = arith.addf %235, %237 : vector<8x64xf32>
    %239 = tpu.reciprocal %238 {approx = true} : vector<8x64xf32> -> vector<8x64xf32>
    %240 = arith.mulf %236, %239 : vector<8x64xf32>
    %241 = arith.truncf %240 : vector<8x64xf32> to vector<8x64xbf16>
    %c6_135 = arith.constant 6 : index
    %c0_136 = arith.constant 0 : index
    %c0_137 = arith.constant 0 : index
    %242 = vector.load %arg2[%c6_135, %c0_136, %c0_137] : memref<13x64x64xbf16, #tpu.memory_space<vmem>>, vector<1x64x64xbf16>
    %243 = vector.shape_cast %242 : vector<1x64x64xbf16> to vector<64x64xbf16>
    %cst_138 = arith.constant dense<0.000000e+00> : vector<8x64xf32>
    %244 = tpu.matmul %241, %243, %cst_138 {dimension_numbers = #tpu.dot_dimension_numbers<[1], [0], [0], [1], [0, 0, 1, 1], [], []>} : vector<8x64xbf16>, vector<64x64xbf16>, vector<8x64xf32> -> vector<8x64xf32>
    %c4_139 = arith.constant 4 : index
    %c0_140 = arith.constant 0 : index
    %c0_141 = arith.constant 0 : index
    %245 = vector.load %arg3[%c4_139, %c0_140, %c0_141] : memref<16x8x64xf32, #tpu.memory_space<vmem>>, vector<1x8x64xf32>
    %246 = vector.shape_cast %245 : vector<1x8x64xf32> to vector<8x64xf32>
    %247 = arith.addf %244, %246 : vector<8x64xf32>
    %cst_142 = arith.constant 2.000000e+01 : f32
    %248 = vector.broadcast %cst_142 : f32 to vector<8x64xf32>
    %249 = arith.minimumf %247, %248 : vector<8x64xf32>
    %250 = math.exp %249 : vector<8x64xf32>
    %cst_143 = arith.constant 2.000000e+00 : f32
    %251 = vector.broadcast %cst_143 : f32 to vector<8x64xf32>
    %252 = arith.addf %250, %251 : vector<8x64xf32>
    %253 = arith.mulf %250, %252 : vector<8x64xf32>
    %254 = arith.mulf %247, %253 : vector<8x64xf32>
    %cst_144 = arith.constant 2.000000e+00 : f32
    %255 = vector.broadcast %cst_144 : f32 to vector<8x64xf32>
    %256 = arith.addf %253, %255 : vector<8x64xf32>
    %257 = tpu.reciprocal %256 {approx = true} : vector<8x64xf32> -> vector<8x64xf32>
    %258 = arith.mulf %254, %257 : vector<8x64xf32>
    %259 = arith.truncf %258 : vector<8x64xf32> to vector<8x64xbf16>
    %c7_145 = arith.constant 7 : index
    %c0_146 = arith.constant 0 : index
    %c0_147 = arith.constant 0 : index
    %260 = vector.load %arg2[%c7_145, %c0_146, %c0_147] : memref<13x64x64xbf16, #tpu.memory_space<vmem>>, vector<1x64x64xbf16>
    %261 = vector.shape_cast %260 : vector<1x64x64xbf16> to vector<64x64xbf16>
    %cst_148 = arith.constant dense<0.000000e+00> : vector<8x64xf32>
    %262 = tpu.matmul %259, %261, %cst_148 {dimension_numbers = #tpu.dot_dimension_numbers<[1], [0], [0], [1], [0, 0, 1, 1], [], []>} : vector<8x64xbf16>, vector<64x64xbf16>, vector<8x64xf32> -> vector<8x64xf32>
    %c5_149 = arith.constant 5 : index
    %c0_150 = arith.constant 0 : index
    %c0_151 = arith.constant 0 : index
    %263 = vector.load %arg3[%c5_149, %c0_150, %c0_151] : memref<16x8x64xf32, #tpu.memory_space<vmem>>, vector<1x8x64xf32>
    %264 = vector.shape_cast %263 : vector<1x8x64xf32> to vector<8x64xf32>
    %265 = arith.addf %262, %264 : vector<8x64xf32>
    %cst_152 = arith.constant 2.000000e+01 : f32
    %266 = vector.broadcast %cst_152 : f32 to vector<8x64xf32>
    %267 = arith.minimumf %265, %266 : vector<8x64xf32>
    %268 = math.exp %267 : vector<8x64xf32>
    %cst_153 = arith.constant 2.000000e+00 : f32
    %269 = vector.broadcast %cst_153 : f32 to vector<8x64xf32>
    %270 = arith.addf %268, %269 : vector<8x64xf32>
    %271 = arith.mulf %268, %270 : vector<8x64xf32>
    %272 = arith.mulf %265, %271 : vector<8x64xf32>
    %cst_154 = arith.constant 2.000000e+00 : f32
    %273 = vector.broadcast %cst_154 : f32 to vector<8x64xf32>
    %274 = arith.addf %271, %273 : vector<8x64xf32>
    %275 = tpu.reciprocal %274 {approx = true} : vector<8x64xf32> -> vector<8x64xf32>
    %276 = arith.mulf %272, %275 : vector<8x64xf32>
    %277 = arith.truncf %276 : vector<8x64xf32> to vector<8x64xbf16>
    %c8_155 = arith.constant 8 : index
    %c0_156 = arith.constant 0 : index
    %c0_157 = arith.constant 0 : index
    %278 = vector.load %arg2[%c8_155, %c0_156, %c0_157] : memref<13x64x64xbf16, #tpu.memory_space<vmem>>, vector<1x64x64xbf16>
    %279 = vector.shape_cast %278 : vector<1x64x64xbf16> to vector<64x64xbf16>
    %cst_158 = arith.constant dense<0.000000e+00> : vector<8x64xf32>
    %280 = tpu.matmul %277, %279, %cst_158 {dimension_numbers = #tpu.dot_dimension_numbers<[1], [0], [0], [1], [0, 0, 1, 1], [], []>} : vector<8x64xbf16>, vector<64x64xbf16>, vector<8x64xf32> -> vector<8x64xf32>
    %c6_159 = arith.constant 6 : index
    %c0_160 = arith.constant 0 : index
    %c0_161 = arith.constant 0 : index
    %281 = vector.load %arg3[%c6_159, %c0_160, %c0_161] : memref<16x8x64xf32, #tpu.memory_space<vmem>>, vector<1x8x64xf32>
    %282 = vector.shape_cast %281 : vector<1x8x64xf32> to vector<8x64xf32>
    %283 = arith.addf %280, %282 : vector<8x64xf32>
    %cst_162 = arith.constant 1.00767362 : f32
    %284 = vector.broadcast %cst_162 : f32 to vector<8x64xf32>
    %285 = arith.mulf %284, %221 : vector<8x64xf32>
    %cst_163 = arith.constant 0.124121875 : f32
    %286 = vector.broadcast %cst_163 : f32 to vector<8x64xf32>
    %287 = arith.mulf %286, %283 : vector<8x64xf32>
    %288 = arith.subf %285, %287 : vector<8x64xf32>
    %cst_164 = arith.constant -1.000000e+00 : f32
    %cst_165 = arith.constant 1.000000e+00 : f32
    %289 = vector.broadcast %cst_164 : f32 to vector<8x64xf32>
    %290 = arith.maximumf %289, %288 : vector<8x64xf32>
    %291 = vector.broadcast %cst_165 : f32 to vector<8x64xf32>
    %292 = arith.minimumf %291, %290 : vector<8x64xf32>
    %cst_166 = arith.constant 0.660667121 : f32
    %293 = vector.broadcast %cst_166 : f32 to vector<8x64xf32>
    %294 = arith.mulf %293, %292 : vector<8x64xf32>
    %cst_167 = arith.constant 0.339326322 : f32
    %295 = vector.broadcast %cst_167 : f32 to vector<8x64xf32>
    %296 = arith.mulf %295, %221 : vector<8x64xf32>
    %297 = arith.addf %294, %296 : vector<8x64xf32>
    %c4_168 = arith.constant 4 : index
    %c0_169 = arith.constant 0 : index
    %c0_170 = arith.constant 0 : index
    %298 = vector.load %arg1[%c4_168, %c0_169, %c0_170] : memref<7x8x64xf32, #tpu.memory_space<vmem>>, vector<1x8x64xf32>
    %299 = vector.shape_cast %298 : vector<1x8x64xf32> to vector<8x64xf32>
    %cst_171 = arith.constant 0.0058544823 : f32
    %300 = vector.broadcast %cst_171 : f32 to vector<8x64xf32>
    %301 = arith.mulf %300, %299 : vector<8x64xf32>
    %302 = arith.addf %297, %301 : vector<8x64xf32>
    %303 = arith.truncf %302 : vector<8x64xf32> to vector<8x64xbf16>
    %c4_172 = arith.constant 4 : index
    %c0_173 = arith.constant 0 : index
    %c0_174 = arith.constant 0 : index
    %304 = vector.load %arg2[%c4_172, %c0_173, %c0_174] : memref<13x64x64xbf16, #tpu.memory_space<vmem>>, vector<1x64x64xbf16>
    %305 = vector.shape_cast %304 : vector<1x64x64xbf16> to vector<64x64xbf16>
    %cst_175 = arith.constant dense<0.000000e+00> : vector<8x64xf32>
    %306 = tpu.matmul %303, %305, %cst_175 {dimension_numbers = #tpu.dot_dimension_numbers<[1], [0], [0], [1], [0, 0, 1, 1], [], []>} : vector<8x64xbf16>, vector<64x64xbf16>, vector<8x64xf32> -> vector<8x64xf32>
    %307 = arith.addf %306, %57 : vector<8x64xf32>
    %c14 = arith.constant 14 : index
    %c0_176 = arith.constant 0 : index
    %c0_177 = arith.constant 0 : index
    %308 = vector.load %arg3[%c14, %c0_176, %c0_177] : memref<16x8x64xf32, #tpu.memory_space<vmem>>, vector<1x8x64xf32>
    %309 = vector.shape_cast %308 : vector<1x8x64xf32> to vector<8x64xf32>
    %310 = arith.addf %307, %309 : vector<8x64xf32>
    %cst_178 = arith.constant 2.000000e+01 : f32
    %311 = vector.broadcast %cst_178 : f32 to vector<8x64xf32>
    %312 = arith.minimumf %310, %311 : vector<8x64xf32>
    %313 = math.exp %312 : vector<8x64xf32>
    %cst_179 = arith.constant 2.000000e+00 : f32
    %314 = vector.broadcast %cst_179 : f32 to vector<8x64xf32>
    %315 = arith.addf %313, %314 : vector<8x64xf32>
    %316 = arith.mulf %313, %315 : vector<8x64xf32>
    %317 = arith.mulf %310, %316 : vector<8x64xf32>
    %cst_180 = arith.constant 2.000000e+00 : f32
    %318 = vector.broadcast %cst_180 : f32 to vector<8x64xf32>
    %319 = arith.addf %316, %318 : vector<8x64xf32>
    %320 = tpu.reciprocal %319 {approx = true} : vector<8x64xf32> -> vector<8x64xf32>
    %321 = arith.mulf %317, %320 : vector<8x64xf32>
    %322 = arith.truncf %321 : vector<8x64xf32> to vector<8x64xbf16>
    %c6_181 = arith.constant 6 : index
    %c0_182 = arith.constant 0 : index
    %c0_183 = arith.constant 0 : index
    %323 = vector.load %arg2[%c6_181, %c0_182, %c0_183] : memref<13x64x64xbf16, #tpu.memory_space<vmem>>, vector<1x64x64xbf16>
    %324 = vector.shape_cast %323 : vector<1x64x64xbf16> to vector<64x64xbf16>
    %cst_184 = arith.constant dense<0.000000e+00> : vector<8x64xf32>
    %325 = tpu.matmul %322, %324, %cst_184 {dimension_numbers = #tpu.dot_dimension_numbers<[1], [0], [0], [1], [0, 0, 1, 1], [], []>} : vector<8x64xbf16>, vector<64x64xbf16>, vector<8x64xf32> -> vector<8x64xf32>
    %c4_185 = arith.constant 4 : index
    %c0_186 = arith.constant 0 : index
    %c0_187 = arith.constant 0 : index
    %326 = vector.load %arg3[%c4_185, %c0_186, %c0_187] : memref<16x8x64xf32, #tpu.memory_space<vmem>>, vector<1x8x64xf32>
    %327 = vector.shape_cast %326 : vector<1x8x64xf32> to vector<8x64xf32>
    %328 = arith.addf %325, %327 : vector<8x64xf32>
    %cst_188 = arith.constant 2.000000e+01 : f32
    %329 = vector.broadcast %cst_188 : f32 to vector<8x64xf32>
    %330 = arith.minimumf %328, %329 : vector<8x64xf32>
    %331 = math.exp %330 : vector<8x64xf32>
    %cst_189 = arith.constant 2.000000e+00 : f32
    %332 = vector.broadcast %cst_189 : f32 to vector<8x64xf32>
    %333 = arith.addf %331, %332 : vector<8x64xf32>
    %334 = arith.mulf %331, %333 : vector<8x64xf32>
    %335 = arith.mulf %328, %334 : vector<8x64xf32>
    %cst_190 = arith.constant 2.000000e+00 : f32
    %336 = vector.broadcast %cst_190 : f32 to vector<8x64xf32>
    %337 = arith.addf %334, %336 : vector<8x64xf32>
    %338 = tpu.reciprocal %337 {approx = true} : vector<8x64xf32> -> vector<8x64xf32>
    %339 = arith.mulf %335, %338 : vector<8x64xf32>
    %340 = arith.truncf %339 : vector<8x64xf32> to vector<8x64xbf16>
    %c7_191 = arith.constant 7 : index
    %c0_192 = arith.constant 0 : index
    %c0_193 = arith.constant 0 : index
    %341 = vector.load %arg2[%c7_191, %c0_192, %c0_193] : memref<13x64x64xbf16, #tpu.memory_space<vmem>>, vector<1x64x64xbf16>
    %342 = vector.shape_cast %341 : vector<1x64x64xbf16> to vector<64x64xbf16>
    %cst_194 = arith.constant dense<0.000000e+00> : vector<8x64xf32>
    %343 = tpu.matmul %340, %342, %cst_194 {dimension_numbers = #tpu.dot_dimension_numbers<[1], [0], [0], [1], [0, 0, 1, 1], [], []>} : vector<8x64xbf16>, vector<64x64xbf16>, vector<8x64xf32> -> vector<8x64xf32>
    %c5_195 = arith.constant 5 : index
    %c0_196 = arith.constant 0 : index
    %c0_197 = arith.constant 0 : index
    %344 = vector.load %arg3[%c5_195, %c0_196, %c0_197] : memref<16x8x64xf32, #tpu.memory_space<vmem>>, vector<1x8x64xf32>
    %345 = vector.shape_cast %344 : vector<1x8x64xf32> to vector<8x64xf32>
    %346 = arith.addf %343, %345 : vector<8x64xf32>
    %cst_198 = arith.constant 2.000000e+01 : f32
    %347 = vector.broadcast %cst_198 : f32 to vector<8x64xf32>
    %348 = arith.minimumf %346, %347 : vector<8x64xf32>
    %349 = math.exp %348 : vector<8x64xf32>
    %cst_199 = arith.constant 2.000000e+00 : f32
    %350 = vector.broadcast %cst_199 : f32 to vector<8x64xf32>
    %351 = arith.addf %349, %350 : vector<8x64xf32>
    %352 = arith.mulf %349, %351 : vector<8x64xf32>
    %353 = arith.mulf %346, %352 : vector<8x64xf32>
    %cst_200 = arith.constant 2.000000e+00 : f32
    %354 = vector.broadcast %cst_200 : f32 to vector<8x64xf32>
    %355 = arith.addf %352, %354 : vector<8x64xf32>
    %356 = tpu.reciprocal %355 {approx = true} : vector<8x64xf32> -> vector<8x64xf32>
    %357 = arith.mulf %353, %356 : vector<8x64xf32>
    %358 = arith.truncf %357 : vector<8x64xf32> to vector<8x64xbf16>
    %c8_201 = arith.constant 8 : index
    %c0_202 = arith.constant 0 : index
    %c0_203 = arith.constant 0 : index
    %359 = vector.load %arg2[%c8_201, %c0_202, %c0_203] : memref<13x64x64xbf16, #tpu.memory_space<vmem>>, vector<1x64x64xbf16>
    %360 = vector.shape_cast %359 : vector<1x64x64xbf16> to vector<64x64xbf16>
    %cst_204 = arith.constant dense<0.000000e+00> : vector<8x64xf32>
    %361 = tpu.matmul %358, %360, %cst_204 {dimension_numbers = #tpu.dot_dimension_numbers<[1], [0], [0], [1], [0, 0, 1, 1], [], []>} : vector<8x64xbf16>, vector<64x64xbf16>, vector<8x64xf32> -> vector<8x64xf32>
    %c6_205 = arith.constant 6 : index
    %c0_206 = arith.constant 0 : index
    %c0_207 = arith.constant 0 : index
    %362 = vector.load %arg3[%c6_205, %c0_206, %c0_207] : memref<16x8x64xf32, #tpu.memory_space<vmem>>, vector<1x8x64xf32>
    %363 = vector.shape_cast %362 : vector<1x8x64xf32> to vector<8x64xf32>
    %364 = arith.addf %361, %363 : vector<8x64xf32>
    %cst_208 = arith.constant 1.00259733 : f32
    %365 = vector.broadcast %cst_208 : f32 to vector<8x64xf32>
    %366 = arith.mulf %365, %302 : vector<8x64xf32>
    %cst_209 = arith.constant 0.0721207783 : f32
    %367 = vector.broadcast %cst_209 : f32 to vector<8x64xf32>
    %368 = arith.mulf %367, %364 : vector<8x64xf32>
    %369 = arith.subf %366, %368 : vector<8x64xf32>
    %cst_210 = arith.constant -1.000000e+00 : f32
    %cst_211 = arith.constant 1.000000e+00 : f32
    %370 = vector.broadcast %cst_210 : f32 to vector<8x64xf32>
    %371 = arith.maximumf %370, %369 : vector<8x64xf32>
    %372 = vector.broadcast %cst_211 : f32 to vector<8x64xf32>
    %373 = arith.minimumf %372, %371 : vector<8x64xf32>
    %cst_212 = arith.constant 0.9807235 : f32
    %374 = vector.broadcast %cst_212 : f32 to vector<8x64xf32>
    %375 = arith.mulf %374, %373 : vector<8x64xf32>
    %cst_213 = arith.constant 0.0192764662 : f32
    %376 = vector.broadcast %cst_213 : f32 to vector<8x64xf32>
    %377 = arith.mulf %376, %302 : vector<8x64xf32>
    %378 = arith.addf %375, %377 : vector<8x64xf32>
    %c5_214 = arith.constant 5 : index
    %c0_215 = arith.constant 0 : index
    %c0_216 = arith.constant 0 : index
    %379 = vector.load %arg1[%c5_214, %c0_215, %c0_216] : memref<7x8x64xf32, #tpu.memory_space<vmem>>, vector<1x8x64xf32>
    %380 = vector.shape_cast %379 : vector<1x8x64xf32> to vector<8x64xf32>
    %cst_217 = arith.constant 9.90339554E-4 : f32
    %381 = vector.broadcast %cst_217 : f32 to vector<8x64xf32>
    %382 = arith.mulf %381, %380 : vector<8x64xf32>
    %383 = arith.addf %378, %382 : vector<8x64xf32>
    %384 = arith.truncf %383 : vector<8x64xf32> to vector<8x64xbf16>
    %c4_218 = arith.constant 4 : index
    %c0_219 = arith.constant 0 : index
    %c0_220 = arith.constant 0 : index
    %385 = vector.load %arg2[%c4_218, %c0_219, %c0_220] : memref<13x64x64xbf16, #tpu.memory_space<vmem>>, vector<1x64x64xbf16>
    %386 = vector.shape_cast %385 : vector<1x64x64xbf16> to vector<64x64xbf16>
    %cst_221 = arith.constant dense<0.000000e+00> : vector<8x64xf32>
    %387 = tpu.matmul %384, %386, %cst_221 {dimension_numbers = #tpu.dot_dimension_numbers<[1], [0], [0], [1], [0, 0, 1, 1], [], []>} : vector<8x64xbf16>, vector<64x64xbf16>, vector<8x64xf32> -> vector<8x64xf32>
    %388 = arith.addf %387, %57 : vector<8x64xf32>
    %c15 = arith.constant 15 : index
    %c0_222 = arith.constant 0 : index
    %c0_223 = arith.constant 0 : index
    %389 = vector.load %arg3[%c15, %c0_222, %c0_223] : memref<16x8x64xf32, #tpu.memory_space<vmem>>, vector<1x8x64xf32>
    %390 = vector.shape_cast %389 : vector<1x8x64xf32> to vector<8x64xf32>
    %391 = arith.addf %388, %390 : vector<8x64xf32>
    %cst_224 = arith.constant 2.000000e+01 : f32
    %392 = vector.broadcast %cst_224 : f32 to vector<8x64xf32>
    %393 = arith.minimumf %391, %392 : vector<8x64xf32>
    %394 = math.exp %393 : vector<8x64xf32>
    %cst_225 = arith.constant 2.000000e+00 : f32
    %395 = vector.broadcast %cst_225 : f32 to vector<8x64xf32>
    %396 = arith.addf %394, %395 : vector<8x64xf32>
    %397 = arith.mulf %394, %396 : vector<8x64xf32>
    %398 = arith.mulf %391, %397 : vector<8x64xf32>
    %cst_226 = arith.constant 2.000000e+00 : f32
    %399 = vector.broadcast %cst_226 : f32 to vector<8x64xf32>
    %400 = arith.addf %397, %399 : vector<8x64xf32>
    %401 = tpu.reciprocal %400 {approx = true} : vector<8x64xf32> -> vector<8x64xf32>
    %402 = arith.mulf %398, %401 : vector<8x64xf32>
    %403 = arith.truncf %402 : vector<8x64xf32> to vector<8x64xbf16>
    %c6_227 = arith.constant 6 : index
    %c0_228 = arith.constant 0 : index
    %c0_229 = arith.constant 0 : index
    %404 = vector.load %arg2[%c6_227, %c0_228, %c0_229] : memref<13x64x64xbf16, #tpu.memory_space<vmem>>, vector<1x64x64xbf16>
    %405 = vector.shape_cast %404 : vector<1x64x64xbf16> to vector<64x64xbf16>
    %cst_230 = arith.constant dense<0.000000e+00> : vector<8x64xf32>
    %406 = tpu.matmul %403, %405, %cst_230 {dimension_numbers = #tpu.dot_dimension_numbers<[1], [0], [0], [1], [0, 0, 1, 1], [], []>} : vector<8x64xbf16>, vector<64x64xbf16>, vector<8x64xf32> -> vector<8x64xf32>
    %c4_231 = arith.constant 4 : index
    %c0_232 = arith.constant 0 : index
    %c0_233 = arith.constant 0 : index
    %407 = vector.load %arg3[%c4_231, %c0_232, %c0_233] : memref<16x8x64xf32, #tpu.memory_space<vmem>>, vector<1x8x64xf32>
    %408 = vector.shape_cast %407 : vector<1x8x64xf32> to vector<8x64xf32>
    %409 = arith.addf %406, %408 : vector<8x64xf32>
    %cst_234 = arith.constant 2.000000e+01 : f32
    %410 = vector.broadcast %cst_234 : f32 to vector<8x64xf32>
    %411 = arith.minimumf %409, %410 : vector<8x64xf32>
    %412 = math.exp %411 : vector<8x64xf32>
    %cst_235 = arith.constant 2.000000e+00 : f32
    %413 = vector.broadcast %cst_235 : f32 to vector<8x64xf32>
    %414 = arith.addf %412, %413 : vector<8x64xf32>
    %415 = arith.mulf %412, %414 : vector<8x64xf32>
    %416 = arith.mulf %409, %415 : vector<8x64xf32>
    %cst_236 = arith.constant 2.000000e+00 : f32
    %417 = vector.broadcast %cst_236 : f32 to vector<8x64xf32>
    %418 = arith.addf %415, %417 : vector<8x64xf32>
    %419 = tpu.reciprocal %418 {approx = true} : vector<8x64xf32> -> vector<8x64xf32>
    %420 = arith.mulf %416, %419 : vector<8x64xf32>
    %421 = arith.truncf %420 : vector<8x64xf32> to vector<8x64xbf16>
    %c7_237 = arith.constant 7 : index
    %c0_238 = arith.constant 0 : index
    %c0_239 = arith.constant 0 : index
    %422 = vector.load %arg2[%c7_237, %c0_238, %c0_239] : memref<13x64x64xbf16, #tpu.memory_space<vmem>>, vector<1x64x64xbf16>
    %423 = vector.shape_cast %422 : vector<1x64x64xbf16> to vector<64x64xbf16>
    %cst_240 = arith.constant dense<0.000000e+00> : vector<8x64xf32>
    %424 = tpu.matmul %421, %423, %cst_240 {dimension_numbers = #tpu.dot_dimension_numbers<[1], [0], [0], [1], [0, 0, 1, 1], [], []>} : vector<8x64xbf16>, vector<64x64xbf16>, vector<8x64xf32> -> vector<8x64xf32>
    %c5_241 = arith.constant 5 : index
    %c0_242 = arith.constant 0 : index
    %c0_243 = arith.constant 0 : index
    %425 = vector.load %arg3[%c5_241, %c0_242, %c0_243] : memref<16x8x64xf32, #tpu.memory_space<vmem>>, vector<1x8x64xf32>
    %426 = vector.shape_cast %425 : vector<1x8x64xf32> to vector<8x64xf32>
    %427 = arith.addf %424, %426 : vector<8x64xf32>
    %cst_244 = arith.constant 2.000000e+01 : f32
    %428 = vector.broadcast %cst_244 : f32 to vector<8x64xf32>
    %429 = arith.minimumf %427, %428 : vector<8x64xf32>
    %430 = math.exp %429 : vector<8x64xf32>
    %cst_245 = arith.constant 2.000000e+00 : f32
    %431 = vector.broadcast %cst_245 : f32 to vector<8x64xf32>
    %432 = arith.addf %430, %431 : vector<8x64xf32>
    %433 = arith.mulf %430, %432 : vector<8x64xf32>
    %434 = arith.mulf %427, %433 : vector<8x64xf32>
    %cst_246 = arith.constant 2.000000e+00 : f32
    %435 = vector.broadcast %cst_246 : f32 to vector<8x64xf32>
    %436 = arith.addf %433, %435 : vector<8x64xf32>
    %437 = tpu.reciprocal %436 {approx = true} : vector<8x64xf32> -> vector<8x64xf32>
    %438 = arith.mulf %434, %437 : vector<8x64xf32>
    %439 = arith.truncf %438 : vector<8x64xf32> to vector<8x64xbf16>
    %c8_247 = arith.constant 8 : index
    %c0_248 = arith.constant 0 : index
    %c0_249 = arith.constant 0 : index
    %440 = vector.load %arg2[%c8_247, %c0_248, %c0_249] : memref<13x64x64xbf16, #tpu.memory_space<vmem>>, vector<1x64x64xbf16>
    %441 = vector.shape_cast %440 : vector<1x64x64xbf16> to vector<64x64xbf16>
    %cst_250 = arith.constant dense<0.000000e+00> : vector<8x64xf32>
    %442 = tpu.matmul %439, %441, %cst_250 {dimension_numbers = #tpu.dot_dimension_numbers<[1], [0], [0], [1], [0, 0, 1, 1], [], []>} : vector<8x64xbf16>, vector<64x64xbf16>, vector<8x64xf32> -> vector<8x64xf32>
    %c6_251 = arith.constant 6 : index
    %c0_252 = arith.constant 0 : index
    %c0_253 = arith.constant 0 : index
    %443 = vector.load %arg3[%c6_251, %c0_252, %c0_253] : memref<16x8x64xf32, #tpu.memory_space<vmem>>, vector<1x8x64xf32>
    %444 = vector.shape_cast %443 : vector<1x8x64xf32> to vector<8x64xf32>
    %445 = arith.addf %442, %444 : vector<8x64xf32>
    %cst_254 = arith.constant 1.000050e+00 : f32
    %446 = vector.broadcast %cst_254 : f32 to vector<8x64xf32>
    %447 = arith.mulf %446, %383 : vector<8x64xf32>
    %cst_255 = arith.constant 1.000050e-02 : f32
    %448 = vector.broadcast %cst_255 : f32 to vector<8x64xf32>
    %449 = arith.mulf %448, %445 : vector<8x64xf32>
    %450 = arith.subf %447, %449 : vector<8x64xf32>
    %cst_256 = arith.constant -1.000000e+00 : f32
    %cst_257 = arith.constant 1.000000e+00 : f32
    %451 = vector.broadcast %cst_256 : f32 to vector<8x64xf32>
    %452 = arith.maximumf %451, %450 : vector<8x64xf32>
    %453 = vector.broadcast %cst_257 : f32 to vector<8x64xf32>
    %454 = arith.minimumf %453, %452 : vector<8x64xf32>
    %cst_258 = arith.constant 1.000000e+00 : f32
    %455 = vector.broadcast %cst_258 : f32 to vector<8x64xf32>
    %456 = arith.mulf %455, %454 : vector<8x64xf32>
    %cst_259 = arith.constant 0.000000e+00 : f32
    %457 = vector.broadcast %cst_259 : f32 to vector<8x64xf32>
    %458 = arith.mulf %457, %383 : vector<8x64xf32>
    %459 = arith.addf %456, %458 : vector<8x64xf32>
    %cst_260 = arith.constant -1.000000e+00 : f32
    %cst_261 = arith.constant 1.000000e+00 : f32
    %460 = vector.broadcast %cst_260 : f32 to vector<8x64xf32>
    %461 = arith.maximumf %460, %459 : vector<8x64xf32>
    %462 = vector.broadcast %cst_261 : f32 to vector<8x64xf32>
    %463 = arith.minimumf %462, %461 : vector<8x64xf32>
    %464 = arith.truncf %463 : vector<8x64xf32> to vector<8x64xbf16>
    %c9 = arith.constant 9 : index
    %c0_262 = arith.constant 0 : index
    %c0_263 = arith.constant 0 : index
    %465 = vector.load %arg2[%c9, %c0_262, %c0_263] : memref<13x64x64xbf16, #tpu.memory_space<vmem>>, vector<1x64x64xbf16>
    %466 = vector.shape_cast %465 : vector<1x64x64xbf16> to vector<64x64xbf16>
    %cst_264 = arith.constant dense<0.000000e+00> : vector<8x64xf32>
    %467 = tpu.matmul %464, %466, %cst_264 {dimension_numbers = #tpu.dot_dimension_numbers<[1], [0], [0], [1], [0, 0, 1, 1], [], []>} : vector<8x64xbf16>, vector<64x64xbf16>, vector<8x64xf32> -> vector<8x64xf32>
    %c7_265 = arith.constant 7 : index
    %c0_266 = arith.constant 0 : index
    %c0_267 = arith.constant 0 : index
    %468 = vector.load %arg3[%c7_265, %c0_266, %c0_267] : memref<16x8x64xf32, #tpu.memory_space<vmem>>, vector<1x8x64xf32>
    %469 = vector.shape_cast %468 : vector<1x8x64xf32> to vector<8x64xf32>
    %470 = arith.addf %467, %469 : vector<8x64xf32>
    %471 = arith.addf %53, %470 : vector<8x64xf32>
    %472 = arith.truncf %471 : vector<8x64xf32> to vector<8x64xbf16>
    %c10 = arith.constant 10 : index
    %c0_268 = arith.constant 0 : index
    %c0_269 = arith.constant 0 : index
    %473 = vector.load %arg2[%c10, %c0_268, %c0_269] : memref<13x64x64xbf16, #tpu.memory_space<vmem>>, vector<1x64x64xbf16>
    %474 = vector.shape_cast %473 : vector<1x64x64xbf16> to vector<64x64xbf16>
    %cst_270 = arith.constant dense<0.000000e+00> : vector<8x64xf32>
    %475 = tpu.matmul %472, %474, %cst_270 {dimension_numbers = #tpu.dot_dimension_numbers<[1], [0], [0], [1], [0, 0, 1, 1], [], []>} : vector<8x64xbf16>, vector<64x64xbf16>, vector<8x64xf32> -> vector<8x64xf32>
    %c8_271 = arith.constant 8 : index
    %c0_272 = arith.constant 0 : index
    %c0_273 = arith.constant 0 : index
    %476 = vector.load %arg3[%c8_271, %c0_272, %c0_273] : memref<16x8x64xf32, #tpu.memory_space<vmem>>, vector<1x8x64xf32>
    %477 = vector.shape_cast %476 : vector<1x8x64xf32> to vector<8x64xf32>
    %478 = arith.addf %475, %477 : vector<8x64xf32>
    %cst_274 = arith.constant 2.000000e+01 : f32
    %479 = vector.broadcast %cst_274 : f32 to vector<8x64xf32>
    %480 = arith.minimumf %478, %479 : vector<8x64xf32>
    %481 = math.exp %480 : vector<8x64xf32>
    %cst_275 = arith.constant 2.000000e+00 : f32
    %482 = vector.broadcast %cst_275 : f32 to vector<8x64xf32>
    %483 = arith.addf %481, %482 : vector<8x64xf32>
    %484 = arith.mulf %481, %483 : vector<8x64xf32>
    %485 = arith.mulf %478, %484 : vector<8x64xf32>
    %cst_276 = arith.constant 2.000000e+00 : f32
    %486 = vector.broadcast %cst_276 : f32 to vector<8x64xf32>
    %487 = arith.addf %484, %486 : vector<8x64xf32>
    %488 = tpu.reciprocal %487 {approx = true} : vector<8x64xf32> -> vector<8x64xf32>
    %489 = arith.mulf %485, %488 : vector<8x64xf32>
    %490 = arith.truncf %489 : vector<8x64xf32> to vector<8x64xbf16>
    %c11_277 = arith.constant 11 : index
    %c0_278 = arith.constant 0 : index
    %c0_279 = arith.constant 0 : index
    %491 = vector.load %arg2[%c11_277, %c0_278, %c0_279] : memref<13x64x64xbf16, #tpu.memory_space<vmem>>, vector<1x64x64xbf16>
    %492 = vector.shape_cast %491 : vector<1x64x64xbf16> to vector<64x64xbf16>
    %cst_280 = arith.constant dense<0.000000e+00> : vector<8x64xf32>
    %493 = tpu.matmul %490, %492, %cst_280 {dimension_numbers = #tpu.dot_dimension_numbers<[1], [0], [0], [1], [0, 0, 1, 1], [], []>} : vector<8x64xbf16>, vector<64x64xbf16>, vector<8x64xf32> -> vector<8x64xf32>
    %c9_281 = arith.constant 9 : index
    %c0_282 = arith.constant 0 : index
    %c0_283 = arith.constant 0 : index
    %494 = vector.load %arg3[%c9_281, %c0_282, %c0_283] : memref<16x8x64xf32, #tpu.memory_space<vmem>>, vector<1x8x64xf32>
    %495 = vector.shape_cast %494 : vector<1x8x64xf32> to vector<8x64xf32>
    %496 = arith.addf %493, %495 : vector<8x64xf32>
    %cst_284 = arith.constant 2.000000e+01 : f32
    %497 = vector.broadcast %cst_284 : f32 to vector<8x64xf32>
    %498 = arith.minimumf %496, %497 : vector<8x64xf32>
    %499 = math.exp %498 : vector<8x64xf32>
    %cst_285 = arith.constant 2.000000e+00 : f32
    %500 = vector.broadcast %cst_285 : f32 to vector<8x64xf32>
    %501 = arith.addf %499, %500 : vector<8x64xf32>
    %502 = arith.mulf %499, %501 : vector<8x64xf32>
    %503 = arith.mulf %496, %502 : vector<8x64xf32>
    %cst_286 = arith.constant 2.000000e+00 : f32
    %504 = vector.broadcast %cst_286 : f32 to vector<8x64xf32>
    %505 = arith.addf %502, %504 : vector<8x64xf32>
    %506 = tpu.reciprocal %505 {approx = true} : vector<8x64xf32> -> vector<8x64xf32>
    %507 = arith.mulf %503, %506 : vector<8x64xf32>
    %508 = arith.truncf %507 : vector<8x64xf32> to vector<8x64xbf16>
    %c12_287 = arith.constant 12 : index
    %c0_288 = arith.constant 0 : index
    %c0_289 = arith.constant 0 : index
    %509 = vector.load %arg2[%c12_287, %c0_288, %c0_289] : memref<13x64x64xbf16, #tpu.memory_space<vmem>>, vector<1x64x64xbf16>
    %510 = vector.shape_cast %509 : vector<1x64x64xbf16> to vector<64x64xbf16>
    %cst_290 = arith.constant dense<0.000000e+00> : vector<8x64xf32>
    %511 = tpu.matmul %508, %510, %cst_290 {dimension_numbers = #tpu.dot_dimension_numbers<[1], [0], [0], [1], [0, 0, 1, 1], [], []>} : vector<8x64xbf16>, vector<64x64xbf16>, vector<8x64xf32> -> vector<8x64xf32>
    %c10_291 = arith.constant 10 : index
    %c0_292 = arith.constant 0 : index
    %c0_293 = arith.constant 0 : index
    %512 = vector.load %arg3[%c10_291, %c0_292, %c0_293] : memref<16x8x64xf32, #tpu.memory_space<vmem>>, vector<1x8x64xf32>
    %513 = vector.shape_cast %512 : vector<1x8x64xf32> to vector<8x64xf32>
    %514 = arith.addf %511, %513 : vector<8x64xf32>
    %515 = math.tanh %514 : vector<8x64xf32>
    %516 = arith.addf %45, %463 : vector<8x64xf32>
    %517 = arith.addf %516, %515 : vector<8x64xf32>
    %518 = vector.extract_strided_slice %517 {offsets = [0, 0], sizes = [8, 45], strides = [1, 1]} : vector<8x64xf32> to vector<8x45xf32>
    %c0_294 = arith.constant 0 : index
    %c0_295 = arith.constant 0 : index
    %519 = vector.load %arg4[%c0_294, %c0_295] : memref<8x45xf32, #tpu.memory_space<vmem>>, vector<8x45xf32>
    tpu.vector_store %arg4[%c0_294, %c0_295], %518 {strides = array<i32>} : memref<8x45xf32, #tpu.memory_space<vmem>>, vector<8x45xf32>,
    return
  }
  func.func @transform_0(%arg0: i32) -> (i32, i32, i32) {
    %c0_i32 = arith.constant 0 : i32
    %c0_i32_0 = arith.constant 0 : i32
    %c0_i32_1 = arith.constant 0 : i32
    return %c0_i32, %arg0, %c0_i32_0 : i32, i32, i32
  }
  func.func @transform_1(%arg0: i32) -> (i32, i32, i32) {
    %c0_i32 = arith.constant 0 : i32
    %c0_i32_0 = arith.constant 0 : i32
    %c0_i32_1 = arith.constant 0 : i32
    %c0_i32_2 = arith.constant 0 : i32
    return %c0_i32, %c0_i32_0, %c0_i32_1 : i32, i32, i32
  }
  func.func @transform_2(%arg0: i32) -> (i32, i32, i32) {
    %c0_i32 = arith.constant 0 : i32
    %c0_i32_0 = arith.constant 0 : i32
    %c0_i32_1 = arith.constant 0 : i32
    %c0_i32_2 = arith.constant 0 : i32
    return %c0_i32, %c0_i32_0, %c0_i32_1 : i32, i32, i32
  }
  func.func @transform_3(%arg0: i32) -> (i32, i32) {
    %c0_i32 = arith.constant 0 : i32
    %c0_i32_0 = arith.constant 0 : i32
    return %arg0, %c0_i32 : i32, i32
  }
}

</mosaic_0001>

<bundles_post_ra>
// kernel: fwd.1
= control target key start
LH: loop header
LB: loop body
LE: loop exit
PB: predicated region body
PF: predicated region fallthrough
CT: control target
= control target key end

     0   :  { %s2206_s0 = inlined_call_operand.vmem [shape: f32[7,8,64], index: 0, kind: input, shape index: {}]   ;;  %s2207_s1 = inlined_call_operand.vmem [shape: bf16[13,64,64], index: 1, kind: input, shape index: {}]   ;;  %s2208_s2 = inlined_call_operand.vmem [shape: f32[16,8,64], index: 2, kind: input, shape index: {}]   ;;  %s2209_s3 = inlined_call_operand.hbm [shape: f32[8,45], index: 3, kind: output, shape index: {}]  }
   0x1   :  { %v1591_v0 = vld [vmem:[%s2207_s1 + $0x18] sm:$0xff]  ;;  %v1590_v1 = vld [vmem:[%s2207_s1 + $0x10] sm:$0xff] }
   0x2   :  { %59 = vmatpush.bf16.msra.mxu0 %v1591_v0 }
   0x3   :  { %8 = vsyncpa [#allocation3], 0  ;;  %v1589_v2 = vld [vmem:[%s2207_s1 + $0x8] sm:$0xff]  ;;  %v1588_v3 = vld [vmem:[%s2207_s1] sm:$0xff]  ;;  %vm51_vm0 = vcmask 523264   ;;  %s1747_s22 = smov [#allocation2]  }
   0x4   :  { %v1783_v4 = vld [vmem:[%s2206_s0] sm:$0xff]  ;;  %v1595_v6 = vld [vmem:[%s2207_s1 + $0x38] sm:$0xff]  ;;  %v1594_v7 = vld [vmem:[%s2207_s1 + $0x30] sm:$0xff]  ;;  %s1218_s23 = sshll.u32 %s1747_s22, 4  ;;  %s1220_s26 = sshll.u32 %s2209_s3, 4  ;;  %vm1211_vm1 = vcmask 367616   ;;  %s1219_s23 = int_to_ptr.vmem [resolvable:$true] %s1218_s23  ;;  %s1221_s26 = int_to_ptr.hbm [resolvable:$true] %s1220_s26 }
   0x5   :  { %v17_v5 = vpack.c.bf16 %v1783_v4, %v1783_v4  ;;  %120 = vmatpush.bf16.msra.mxu1 %v1595_v6  ;;  %v1593_v8 = vld [vmem:[%s2207_s1 + $0x28] sm:$0xff]  ;;  %v1592_v9 = vld [vmem:[%s2207_s1 + $0x20] sm:$0xff]  ;;  %v1599_v24 = vld [vmem:[%s2207_s1 + $0x58] sm:$0xff] }
   0x6   :  { %60 = vmatpush.bf16.msra.mxu0 %v1590_v1  ;;  %v26_v10 = vld [vmem:[%s2208_s2] sm:$0xff]  ;;  %181 = vmatpush.bf16.msra.mxu2 %v1599_v24  ;;  %v1598_v25 = vld [vmem:[%s2207_s1 + $0x50] sm:$0xff]  ;;  %v1597_v26 = vld [vmem:[%s2207_s1 + $0x48] sm:$0xff] }
   0x7   :  { %v1596_v27 = vld [vmem:[%s2207_s1 + $0x40] sm:$0xff]  ;;  %v1254_v28 = vld [vmem:[%s2208_s2 + $0x8] sm:$0xff]  ;;  %v1603_v29 = vld [vmem:[%s2207_s1 + $0x78] sm:$0xff] }
   0x8   :  { %234 = vmatpush.bf16.msra.mxu3 %v1603_v29  ;;  %v1602_v43 = vld [vmem:[%s2207_s1 + $0x70] sm:$0xff]  ;;  %v1601_v44 = vld [vmem:[%s2207_s1 + $0x68] sm:$0xff]  ;;  %v1600_v45 = vld [vmem:[%s2207_s1 + $0x60] sm:$0xff] }
   0x9   :  { %121 = vmatpush.bf16.msra.mxu1 %v1594_v7  ;;  %v1835_v46 = vld [vmem:[%s2207_s1 + $0x98] sm:$0xff]  ;;  %v1844_v48 = vld [vmem:[%s2207_s1 + $0x90] sm:$0xff]  ;;  %v1853_v50 = vld [vmem:[%s2207_s1 + $0x88] sm:$0xff] }
   0xa   :  { %61 = vmatpush.bf16.msra.mxu0 %v1589_v2  ;;  %182 = vmatpush.bf16.msra.mxu2 %v1598_v25  ;;  %v1607_v47 = vld [vmem:[%s2207_s1 + $0xb8] sm:$0xff]  ;;  %v1606_v49 = vld [vmem:[%s2207_s1 + $0xb0] sm:$0xff]  ;;  %v1605_v51 = vld [vmem:[%s2207_s1 + $0xa8] sm:$0xff] }
   0xb   :  { %v1862_v52 = vld [vmem:[%s2207_s1 + $0x80] sm:$0xff]  ;;  %v1867_v53 = vld [vmem:[%s2206_s0 + $0x8] sm:$0xff]  ;;  %v1280_v55 = vld [vmem:[%s2208_s2 + $0x10] sm:$0xff] }
   0xc   :  { %235 = vmatpush.bf16.msra.mxu3 %v1602_v43  ;;  %v296_v54 = vpack.c.bf16 %v1867_v53, %v1867_v53  ;;  %v1604_v61 = vld [vmem:[%s2207_s1 + $0xa0] sm:$0xff]  ;;  %v1306_v0 = vld [vmem:[%s2208_s2 + $0x18] sm:$0xff] }
   0xd   :  { %122 = vmatpush.bf16.msra.mxu1 %v1593_v8  ;;  %v1904_v7 = vld [vmem:[%s2207_s1 + $0xd8] sm:$0xff]  ;;  %v1910_v8 = vld [vmem:[%s2207_s1 + $0xd0] sm:$0xff]  ;;  %v1968_v29 = vld [vmem:[%s2208_s2 + $0x20] sm:$0xff] }
   0xe   :  { %62 = vmatpush.bf16.msra.mxu0 %v1588_v3  ;;  %183 = vmatpush.bf16.msra.mxu2 %v1597_v26  ;;  %v1943_v25 = vld [vmem:[%s2207_s1 + $0xf8] sm:$0xff]  ;;  %v1949_v26 = vld [vmem:[%s2207_s1 + $0xf0] sm:$0xff] }
   0xf   :  { %v1982_v43 = vld [vmem:[%s2207_s1 + $0x118] sm:$0xff] }
  0x10   :  { %236 = vmatpush.bf16.msra.mxu3 %v1601_v44  ;;  %v1988_v44 = vld [vmem:[%s2207_s1 + $0x110] sm:$0xff] }
  0x11   :  { %1245 = vmatmul.msk.bf16.vlgmr.msra.gmra.mxu0 %vm51_vm0, %v17_v5  ;;  %123 = vmatpush.bf16.msra.mxu1 %v1592_v9  ;;  %v1922_v9 = vld [vmem:[%s2207_s1 + $0xc0] sm:$0xff] }
  0x12   :  { %184 = vmatpush.bf16.msra.mxu2 %v1596_v27  ;;  %285 = vmatpush.bf16.msrb.mxu0 %v1607_v47  ;;  %v1955_v27 = vld [vmem:[%s2207_s1 + $0xe8] sm:$0xff]  ;;  %v2000_v47 = vld [vmem:[%s2207_s1 + $0x100] sm:$0xff] }
  0x14   :  { %237 = vmatpush.bf16.msra.mxu3 %v1600_v45  ;;  %v1994_v45 = vld [vmem:[%s2207_s1 + $0x108] sm:$0xff] }
  0x15   :  { %337 = vmatpush.bf16.msrb.mxu1 %v1835_v46 }
  0x16   :  { %286 = vmatpush.bf16.msrb.mxu0 %v1606_v49  ;;  %401 = vmatpush.bf16.msrb.mxu2 %v1904_v7  ;;  %v2007_v49 = vld [vmem:[%s2208_s2 + $0x28] sm:$0xff] }
  0x18   :  { %462 = vmatpush.bf16.msrb.mxu3 %v1943_v25 }
  0x19   :  { %338 = vmatpush.bf16.msrb.mxu1 %v1844_v48 }
  0x1a   :  { %287 = vmatpush.bf16.msrb.mxu0 %v1605_v51  ;;  %402 = vmatpush.bf16.msrb.mxu2 %v1910_v8 }
  0x1c   :  { %463 = vmatpush.bf16.msrb.mxu3 %v1949_v26 }
  0x1d   :  { %339 = vmatpush.bf16.msrb.mxu1 %v1853_v50 }
  0x1e   :  { %288 = vmatpush.bf16.msrb.mxu0 %v1604_v61 }
  0x20   :  { %464 = vmatpush.bf16.msrb.mxu3 %v1955_v27 }
  0x21   :  { %340 = vmatpush.bf16.msrb.mxu1 %v1862_v52 }
  0x22   :  { %523 = vmatpush.bf16.msra.mxu0 %v1982_v43 }
  0x26   :  { %524 = vmatpush.bf16.msra.mxu0 %v1988_v44 }
  0x2a   :  { %525 = vmatpush.bf16.msra.mxu0 %v1994_v45 }
  0x2e   :  { %526 = vmatpush.bf16.msra.mxu0 %v2000_v47 }
  0x8e   :  { %v64_v11 = vpop.f32.mrf.mxu0 }
  0x8f   :  { %v65_v12 = vadd.f32 %v64_v11, %v26_v10  ;;  %v1375_v11 = vld [vmem:[%s2208_s2 + $0x58] sm:$0xff] }
  0x91   :  { %v68_v13 = vmin.f32 %v65_v12, 20.0 }
  0x93   :  { %v69_v14 = vmul.f32 1.442695, %v68_v13 }
  0x95   :  { %1641 = vpow2.f32 %v69_v14 }
  0x96   :  { %v66_v15 = vpop.f32.mrf.mxu0 }
  0x9b   :  { %v1642_v16 = vpop.eup %1641 }
  0x9c   :  { %v71_v17 = vadd.f32 2.0, %v1642_v16 }
  0x9e   :  { %v72_v18 = vmul.f32 %v1642_v16, %v71_v17 }
  0xa0   :  { %v74_v19 = vadd.f32 2.0, %v72_v18  ;;  %v73_v20 = vmul.f32 %v72_v18, %v65_v12 }
  0xa2   :  { %1643 = vrcp.f32 %v74_v19 }
  0xa8   :  { %v1644_v21 = vpop.eup %1643 }
  0xa9   :  { %v76_v22 = vmul.f32 %v1644_v21, %v73_v20 }
  0xab   :  { %v77_v23 = vpack.c.bf16 %v76_v22, %v76_v22 }
  0xad   :  { %1271 = vmatmul.msk.bf16.vlgmr.msra.gmra.mxu1 %vm51_vm0, %v77_v23 }
  0xae   :  { %552 = vmatpush.bf16.msra.mxu1 %v1835_v46 }
  0xb2   :  { %553 = vmatpush.bf16.msra.mxu1 %v1844_v48 }
  0xb6   :  { %554 = vmatpush.bf16.msra.mxu1 %v1853_v50 }
  0xba   :  { %555 = vmatpush.bf16.msra.mxu1 %v1862_v52 }
  0xbd   :  { %1374 = vmatmul.msk.bf16.vlgmr.msrb.gmra.mxu1 %vm51_vm0, %v296_v54 }
  0xbe   :  { %662 = vmatpush.bf16.msrb.mxu1 %v1835_v46 }
  0xc2   :  { %663 = vmatpush.bf16.msrb.mxu1 %v1844_v48 }
  0xc6   :  { %664 = vmatpush.bf16.msrb.mxu1 %v1853_v50 }
  0xca   :  { %665 = vmatpush.bf16.msrb.mxu1 %v1862_v52 }
 0x12a   :  { %v125_v30 = vpop.f32.mrf.mxu1 }
 0x12b   :  { %v126_v31 = vadd.f32 %v1254_v28, %v125_v30  ;;  %v1961_v28 = vld [vmem:[%s2207_s1 + $0xe0] sm:$0xff] }
 0x12c   :  { %465 = vmatpush.bf16.msrb.mxu3 %v1961_v28 }
 0x12d   :  { %v129_v32 = vmin.f32 %v126_v31, 20.0 }
 0x12f   :  { %v130_v33 = vmul.f32 1.442695, %v129_v32 }
 0x131   :  { %1645 = vpow2.f32 %v130_v33 }
 0x132   :  { %v127_v34 = vpop.f32.mrf.mxu1 }
 0x137   :  { %v1646_v35 = vpop.eup %1645 }
 0x138   :  { %v132_v36 = vadd.f32 2.0, %v1646_v35 }
 0x13a   :  { %v133_v37 = vmul.f32 %v1646_v35, %v132_v36  ;;  %v342_v62 = vpop.f32.mrf.mxu1 }
 0x13c   :  { %v135_v38 = vadd.f32 2.0, %v133_v37  ;;  %v134_v39 = vmul.f32 %v133_v37, %v126_v31 }
 0x13e   :  { %1647 = vrcp.f32 %v135_v38 }
 0x142   :  { %v344_v63 = vpop.f32.mrf.mxu1 }
 0x144   :  { %v1648_v40 = vpop.eup %1647 }
 0x145   :  { %v137_v41 = vmul.f32 %v1648_v40, %v134_v39 }
 0x147   :  { %v138_v42 = vpack.c.bf16 %v137_v41, %v137_v41 }
 0x149   :  { %1297 = vmatmul.msk.bf16.vlgmr.msra.gmra.mxu2 %vm51_vm0, %v138_v42 }
 0x1cc   :  { %v186_v56 = vpop.f32.mrf.mxu2 }
 0x1cd   :  { %v187_v57 = vadd.f32 %v1280_v55, %v186_v56 }
 0x1cf   :  { %1649 = vtanh.f32 %v187_v57 }
 0x1d4   :  { %v188_v58 = vpop.f32.mrf.mxu2 }
 0x1d5   :  { %v1881_v59 = vpop.eup %1649 }
 0x1d6   :  { %v191_v60 = vpack.c.bf16 %v1881_v59, %v1881_v59 }
 0x1d8   :  { %1323 = vmatmul.msk.bf16.vlgmr.msra.gmra.mxu3 %vm51_vm0, %v191_v60 }
 0x1d9   :  { %607 = vmatpush.bf16.msra.mxu3 %v1943_v25 }
 0x1dd   :  { %608 = vmatpush.bf16.msra.mxu3 %v1949_v26 }
 0x1e1   :  { %609 = vmatpush.bf16.msra.mxu3 %v1955_v27 }
 0x1e5   :  { %610 = vmatpush.bf16.msra.mxu3 %v1961_v28 }
 0x25b   :  { %v239_v1 = vpop.f32.mrf.mxu3 }
 0x25c   :  { %v240_v2 = vadd.f32 %v1306_v0, %v239_v1 }
 0x25e   :  { %v1896_v3 = vadd.f32 %v240_v2, %v1783_v4  ;;  %v1916_v4 = vld [vmem:[%s2207_s1 + $0xc8] sm:$0xff] }
 0x25f   :  { %403 = vmatpush.bf16.msrb.mxu2 %v1916_v4 }
 0x260   :  { %v244_v5 = vpack.c.bf16 %v1896_v3, %v1896_v3 }
 0x262   :  { %1348 = vmatmul.msk.bf16.vlgmr.msrb.gmra.mxu0 %vm51_vm0, %v244_v5  ;;  %v2021_v5 = vld [vmem:[%s2208_s2 + $0x30] sm:$0xff] }
 0x263   :  { %v241_v6 = vpop.f32.mrf.mxu3  ;;  %404 = vmatpush.bf16.msrb.mxu2 %v1922_v9  ;;  %633 = vmatpush.bf16.msrb.mxu0 %v1982_v43 }
 0x267   :  { %581 = vmatpush.bf16.msra.mxu2 %v1904_v7  ;;  %634 = vmatpush.bf16.msrb.mxu0 %v1988_v44 }
 0x26b   :  { %582 = vmatpush.bf16.msra.mxu2 %v1910_v8  ;;  %635 = vmatpush.bf16.msrb.mxu0 %v1994_v45 }
 0x26f   :  { %583 = vmatpush.bf16.msra.mxu2 %v1916_v4  ;;  %636 = vmatpush.bf16.msrb.mxu0 %v2000_v47 }
 0x273   :  { %584 = vmatpush.bf16.msra.mxu2 %v1922_v9 }
 0x2df   :  { %v1927_v10 = vpop.f32.mrf.mxu0 }
 0x2e0   :  { %v343_v12 = vadd.f32 %v342_v62, %v1927_v10 }
 0x2e2   :  { %v348_v13 = vadd.f32 %v1375_v11, %v343_v12  ;;  %v532_v12 = vmul.f32 1.0256383, %v1867_v53 }
 0x2e4   :  { %v349_v14 = vmin.f32 %v348_v13, 20.0 }
 0x2e6   :  { %v350_v15 = vmul.f32 1.442695, %v349_v14 }
 0x2e7   :  { %v292_v16 = vpop.f32.mrf.mxu0 }
 0x2e8   :  { %1651 = vpow2.f32 %v350_v15  ;;  %v1455_v15 = vld [vmem:[%s2206_s0 + $0x10] sm:$0xff] }
 0x2ee   :  { %v1652_v17 = vpop.eup %1651 }
 0x2ef   :  { %v352_v18 = vadd.f32 2.0, %v1652_v17 }
 0x2f1   :  { %v353_v19 = vmul.f32 %v1652_v17, %v352_v18  ;;  %v538_v17 = vmul.f32 0.6009365, %v1867_v53 }
 0x2f3   :  { %v355_v20 = vadd.f32 2.0, %v353_v19  ;;  %v354_v21 = vmul.f32 %v353_v19, %v348_v13 }
 0x2f5   :  { %1653 = vrcp.f32 %v355_v20  ;;  %v542_v20 = vmul.f32 0.011018507, %v1455_v15 }
 0x2fb   :  { %v1654_v22 = vpop.eup %1653 }
 0x2fc   :  { %v357_v23 = vmul.f32 %v1654_v22, %v354_v21 }
 0x2fe   :  { %v358_v24 = vpack.c.bf16 %v357_v23, %v357_v23 }
 0x300   :  { %1401 = vmatmul.msk.bf16.vlgmr.msrb.gmra.mxu2 %vm51_vm0, %v358_v24  ;;  %v1457_v24 = vld [vmem:[%s2208_s2 + $0x60] sm:$0xff] }
 0x301   :  { %691 = vmatpush.bf16.msrb.mxu2 %v1904_v7 }
 0x305   :  { %692 = vmatpush.bf16.msrb.mxu2 %v1910_v8 }
 0x309   :  { %693 = vmatpush.bf16.msrb.mxu2 %v1916_v4 }
 0x30d   :  { %694 = vmatpush.bf16.msrb.mxu2 %v1922_v9 }
 0x383   :  { %v406_v30 = vpop.f32.mrf.mxu2 }
 0x384   :  { %v407_v31 = vadd.f32 %v1968_v29, %v406_v30 }
 0x386   :  { %v410_v32 = vmin.f32 %v407_v31, 20.0 }
 0x388   :  { %v411_v33 = vmul.f32 1.442695, %v410_v32 }
 0x38a   :  { %1655 = vpow2.f32 %v411_v33 }
 0x38b   :  { %v408_v34 = vpop.f32.mrf.mxu2 }
 0x390   :  { %v1656_v35 = vpop.eup %1655 }
 0x391   :  { %v413_v36 = vadd.f32 2.0, %v1656_v35 }
 0x393   :  { %v414_v37 = vmul.f32 %v1656_v35, %v413_v36 }
 0x395   :  { %v416_v38 = vadd.f32 2.0, %v414_v37  ;;  %v415_v39 = vmul.f32 %v414_v37, %v407_v31 }
 0x397   :  { %1657 = vrcp.f32 %v416_v38 }
 0x39d   :  { %v1658_v40 = vpop.eup %1657 }
 0x39e   :  { %v418_v41 = vmul.f32 %v1658_v40, %v415_v39 }
 0x3a0   :  { %v419_v42 = vpack.c.bf16 %v418_v41, %v418_v41 }
 0x3a2   :  { %1427 = vmatmul.msk.bf16.vlgmr.msrb.gmra.mxu3 %vm51_vm0, %v419_v42 }
 0x3a3   :  { %717 = vmatpush.bf16.msrb.mxu3 %v1943_v25 }
 0x3a7   :  { %718 = vmatpush.bf16.msrb.mxu3 %v1949_v26 }
 0x3ab   :  { %719 = vmatpush.bf16.msrb.mxu3 %v1955_v27 }
 0x3af   :  { %720 = vmatpush.bf16.msrb.mxu3 %v1961_v28 }
 0x425   :  { %v467_v51 = vpop.f32.mrf.mxu3 }
 0x426   :  { %v468_v54 = vadd.f32 %v2007_v49, %v467_v51 }
 0x428   :  { %v471_v55 = vmin.f32 %v468_v54, 20.0 }
 0x42a   :  { %v472_v56 = vmul.f32 1.442695, %v471_v55 }
 0x42c   :  { %1659 = vpow2.f32 %v472_v56 }
 0x42d   :  { %v469_v57 = vpop.f32.mrf.mxu3 }
 0x432   :  { %v1660_v58 = vpop.eup %1659 }
 0x433   :  { %v474_v60 = vadd.f32 2.0, %v1660_v58 }
 0x435   :  { %v475_v61 = vmul.f32 %v1660_v58, %v474_v60 }
 0x437   :  { %v477_v62 = vadd.f32 2.0, %v475_v61  ;;  %v476_v63 = vmul.f32 %v475_v61, %v468_v54 }
 0x439   :  { %1661 = vrcp.f32 %v477_v62 }
 0x43f   :  { %v1662_v0 = vpop.eup %1661 }
 0x440   :  { %v479_v1 = vmul.f32 %v1662_v0, %v476_v63 }
 0x442   :  { %v480_v2 = vpack.c.bf16 %v479_v1, %v479_v1 }
 0x444   :  { %1453 = vmatmul.msk.bf16.vlgmr.msra.gmra.mxu0 %vm51_vm0, %v480_v2 }
 0x445   :  { %743 = vmatpush.bf16.msra.mxu0 %v1982_v43 }
 0x449   :  { %744 = vmatpush.bf16.msra.mxu0 %v1988_v44 }
 0x44d   :  { %745 = vmatpush.bf16.msra.mxu0 %v1994_v45 }
 0x451   :  { %746 = vmatpush.bf16.msra.mxu0 %v2000_v47 }
 0x4c1   :  { %v528_v6 = vpop.f32.mrf.mxu0 }
 0x4c2   :  { %v529_v11 = vadd.f32 %v2021_v5, %v528_v6 }
 0x4c4   :  { %v533_v13 = vmul.f32 0.2278906, %v529_v11 }
 0x4c6   :  { %v534_v14 = vsub.f32 %v532_v12, %v533_v13 }
 0x4c8   :  { %v1454_v16 = vclamps-f32 %v534_v14, 1.0 }
 0x4c9   :  { %v530_v18 = vpop.f32.mrf.mxu0 }
 0x4ca   :  { %v537_v19 = vmul.f32 0.39898667, %v1454_v16 }
 0x4cc   :  { %v539_v21 = vadd.f32 %v538_v17, %v537_v19 }
 0x4ce   :  { %v2029_v22 = vadd.f32 %v542_v20, %v539_v21 }
 0x4d0   :  { %v544_v23 = vpack.c.bf16 %v2029_v22, %v2029_v22 }
 0x4d2   :  { %1456 = vmatmul.msk.bf16.vlgmr.msra.gmra.mxu1 %vm51_vm0, %v544_v23 }
 0x4d3   :  { %772 = vmatpush.bf16.msra.mxu1 %v1835_v46 }
 0x4d7   :  { %773 = vmatpush.bf16.msra.mxu1 %v1844_v48 }
 0x4db   :  { %774 = vmatpush.bf16.msra.mxu1 %v1853_v50 }
 0x4df   :  { %775 = vmatpush.bf16.msra.mxu1 %v1862_v52 }
 0x54f   :  { %v557_v53 = vpop.f32.mrf.mxu1 }
 0x550   :  { %v558_v30 = vadd.f32 %v557_v53, %v1927_v10 }
 0x552   :  { %v563_v31 = vadd.f32 %v1457_v24, %v558_v30  ;;  %v642_v30 = vmul.f32 1.0153302, %v2029_v22 }
 0x554   :  { %v564_v32 = vmin.f32 %v563_v31, 20.0 }
 0x556   :  { %v565_v33 = vmul.f32 1.442695, %v564_v32 }
 0x557   :  { %v559_v34 = vpop.f32.mrf.mxu1 }
 0x558   :  { %1663 = vpow2.f32 %v565_v33  ;;  %v1462_v33 = vld [vmem:[%s2206_s0 + $0x18] sm:$0xff] }
 0x55e   :  { %v1664_v35 = vpop.eup %1663 }
 0x55f   :  { %v567_v36 = vadd.f32 2.0, %v1664_v35 }
 0x561   :  { %v568_v37 = vmul.f32 %v1664_v35, %v567_v36 }
 0x563   :  { %v570_v38 = vadd.f32 2.0, %v568_v37  ;;  %v569_v39 = vmul.f32 %v568_v37, %v563_v31  ;;  %v648_v37 = vmul.f32 0.50244623, %v2029_v22  ;;  %v1464_v22 = vld [vmem:[%s2208_s2 + $0x68] sm:$0xff] }
 0x565   :  { %1665 = vrcp.f32 %v570_v38  ;;  %v652_v38 = vmul.f32 0.008721592, %v1462_v33 }
 0x56b   :  { %v1666_v40 = vpop.eup %1665 }
 0x56c   :  { %v572_v41 = vmul.f32 %v1666_v40, %v569_v39 }
 0x56e   :  { %v573_v42 = vpack.c.bf16 %v572_v41, %v572_v41 }
 0x570   :  { %1458 = vmatmul.msk.bf16.vlgmr.msra.gmra.mxu2 %vm51_vm0, %v573_v42 }
 0x571   :  { %801 = vmatpush.bf16.msra.mxu2 %v1904_v7 }
 0x575   :  { %802 = vmatpush.bf16.msra.mxu2 %v1910_v8 }
 0x579   :  { %803 = vmatpush.bf16.msra.mxu2 %v1916_v4 }
 0x57d   :  { %804 = vmatpush.bf16.msra.mxu2 %v1922_v9 }
 0x5f3   :  { %v586_v51 = vpop.f32.mrf.mxu2 }
 0x5f4   :  { %v587_v54 = vadd.f32 %v1968_v29, %v586_v51 }
 0x5f6   :  { %v590_v55 = vmin.f32 %v587_v54, 20.0 }
 0x5f8   :  { %v591_v56 = vmul.f32 1.442695, %v590_v55 }
 0x5fa   :  { %1667 = vpow2.f32 %v591_v56 }
 0x5fb   :  { %v588_v57 = vpop.f32.mrf.mxu2 }
 0x600   :  { %v1668_v58 = vpop.eup %1667 }
 0x601   :  { %v593_v60 = vadd.f32 2.0, %v1668_v58 }
 0x603   :  { %v594_v61 = vmul.f32 %v1668_v58, %v593_v60 }
 0x605   :  { %v596_v62 = vadd.f32 2.0, %v594_v61  ;;  %v595_v63 = vmul.f32 %v594_v61, %v587_v54 }
 0x607   :  { %1669 = vrcp.f32 %v596_v62 }
 0x60d   :  { %v1670_v0 = vpop.eup %1669 }
 0x60e   :  { %v598_v1 = vmul.f32 %v1670_v0, %v595_v63 }
 0x610   :  { %v599_v2 = vpack.c.bf16 %v598_v1, %v598_v1 }
 0x612   :  { %1459 = vmatmul.msk.bf16.vlgmr.msra.gmra.mxu3 %vm51_vm0, %v599_v2 }
 0x613   :  { %827 = vmatpush.bf16.msra.mxu3 %v1943_v25 }
 0x617   :  { %828 = vmatpush.bf16.msra.mxu3 %v1949_v26 }
 0x61b   :  { %829 = vmatpush.bf16.msra.mxu3 %v1955_v27 }
 0x61f   :  { %830 = vmatpush.bf16.msra.mxu3 %v1961_v28 }
 0x695   :  { %v612_v6 = vpop.f32.mrf.mxu3 }
 0x696   :  { %v613_v11 = vadd.f32 %v2007_v49, %v612_v6 }
 0x698   :  { %v616_v12 = vmin.f32 %v613_v11, 20.0 }
 0x69a   :  { %v617_v13 = vmul.f32 1.442695, %v616_v12 }
 0x69c   :  { %1671 = vpow2.f32 %v617_v13 }
 0x69d   :  { %v614_v14 = vpop.f32.mrf.mxu3 }
 0x6a2   :  { %v1672_v15 = vpop.eup %1671 }
 0x6a3   :  { %v619_v16 = vadd.f32 2.0, %v1672_v15 }
 0x6a5   :  { %v620_v17 = vmul.f32 %v1672_v15, %v619_v16 }
 0x6a7   :  { %v622_v18 = vadd.f32 2.0, %v620_v17  ;;  %v621_v19 = vmul.f32 %v620_v17, %v613_v11 }
 0x6a9   :  { %1673 = vrcp.f32 %v622_v18 }
 0x6af   :  { %v1674_v20 = vpop.eup %1673 }
 0x6b0   :  { %v624_v21 = vmul.f32 %v1674_v20, %v621_v19 }
 0x6b2   :  { %v625_v23 = vpack.c.bf16 %v624_v21, %v624_v21 }
 0x6b4   :  { %1460 = vmatmul.msk.bf16.vlgmr.msrb.gmra.mxu0 %vm51_vm0, %v625_v23 }
 0x6b5   :  { %853 = vmatpush.bf16.msrb.mxu0 %v1982_v43 }
 0x6b9   :  { %854 = vmatpush.bf16.msrb.mxu0 %v1988_v44 }
 0x6bd   :  { %855 = vmatpush.bf16.msrb.mxu0 %v1994_v45 }
 0x6c1   :  { %856 = vmatpush.bf16.msrb.mxu0 %v2000_v47 }
 0x731   :  { %v638_v53 = vpop.f32.mrf.mxu0 }
 0x732   :  { %v639_v24 = vadd.f32 %v2021_v5, %v638_v53 }
 0x734   :  { %v643_v31 = vmul.f32 0.175771, %v639_v24 }
 0x736   :  { %v644_v32 = vsub.f32 %v642_v30, %v643_v31 }
 0x738   :  { %v1461_v34 = vclamps-f32 %v644_v32, 1.0 }
 0x739   :  { %v640_v35 = vpop.f32.mrf.mxu0 }
 0x73a   :  { %v647_v36 = vmul.f32 0.49752483, %v1461_v34  ;;  %v1469_v34 = vld [vmem:[%s2206_s0 + $0x20] sm:$0xff] }
 0x73c   :  { %v649_v39 = vadd.f32 %v648_v37, %v647_v36  ;;  %v762_v37 = vmul.f32 0.0058544823, %v1469_v34 }
 0x73e   :  { %v2065_v40 = vadd.f32 %v652_v38, %v649_v39 }
 0x740   :  { %v654_v41 = vpack.c.bf16 %v2065_v40, %v2065_v40  ;;  %v752_v31 = vmul.f32 1.0076736, %v2065_v40 }
 0x742   :  { %1463 = vmatmul.msk.bf16.vlgmr.msrb.gmra.mxu1 %vm51_vm0, %v654_v41  ;;  %v1471_v41 = vld [vmem:[%s2208_s2 + $0x70] sm:$0xff] }
 0x743   :  { %882 = vmatpush.bf16.msrb.mxu1 %v1835_v46 }
 0x747   :  { %883 = vmatpush.bf16.msrb.mxu1 %v1844_v48 }
 0x74b   :  { %884 = vmatpush.bf16.msrb.mxu1 %v1853_v50 }
 0x74f   :  { %885 = vmatpush.bf16.msrb.mxu1 %v1862_v52 }
 0x7bf   :  { %v667_v42 = vpop.f32.mrf.mxu1 }
 0x7c0   :  { %v668_v51 = vadd.f32 %v667_v42, %v1927_v10 }
 0x7c2   :  { %v673_v54 = vadd.f32 %v1464_v22, %v668_v51 }
 0x7c4   :  { %v674_v55 = vmin.f32 %v673_v54, 20.0 }
 0x7c6   :  { %v675_v56 = vmul.f32 1.442695, %v674_v55 }
 0x7c7   :  { %v669_v57 = vpop.f32.mrf.mxu1 }
 0x7c8   :  { %1675 = vpow2.f32 %v675_v56 }
 0x7ce   :  { %v1676_v58 = vpop.eup %1675 }
 0x7cf   :  { %v677_v46 = vadd.f32 2.0, %v1676_v58 }
 0x7d1   :  { %v678_v60 = vmul.f32 %v1676_v58, %v677_v46 }
 0x7d3   :  { %v680_v48 = vadd.f32 2.0, %v678_v60  ;;  %v679_v50 = vmul.f32 %v678_v60, %v673_v54 }
 0x7d5   :  { %1677 = vrcp.f32 %v680_v48 }
 0x7db   :  { %v1678_v61 = vpop.eup %1677 }
 0x7dc   :  { %v682_v52 = vmul.f32 %v1678_v61, %v679_v50 }
 0x7de   :  { %v683_v62 = vpack.c.bf16 %v682_v52, %v682_v52 }
 0x7e0   :  { %1465 = vmatmul.msk.bf16.vlgmr.msrb.gmra.mxu2 %vm51_vm0, %v683_v62 }
 0x7e1   :  { %911 = vmatpush.bf16.msrb.mxu2 %v1904_v7 }
 0x7e5   :  { %912 = vmatpush.bf16.msrb.mxu2 %v1910_v8 }
 0x7e9   :  { %913 = vmatpush.bf16.msrb.mxu2 %v1916_v4 }
 0x7ed   :  { %914 = vmatpush.bf16.msrb.mxu2 %v1922_v9 }
 0x863   :  { %v696_v63 = vpop.f32.mrf.mxu2 }
 0x864   :  { %v697_v0 = vadd.f32 %v1968_v29, %v696_v63 }
 0x866   :  { %v700_v1 = vmin.f32 %v697_v0, 20.0 }
 0x868   :  { %v701_v2 = vmul.f32 1.442695, %v700_v1 }
 0x86a   :  { %1679 = vpow2.f32 %v701_v2 }
 0x86b   :  { %v698_v6 = vpop.f32.mrf.mxu2 }
 0x870   :  { %v1680_v11 = vpop.eup %1679 }
 0x871   :  { %v703_v12 = vadd.f32 2.0, %v1680_v11 }
 0x873   :  { %v704_v13 = vmul.f32 %v1680_v11, %v703_v12 }
 0x875   :  { %v706_v14 = vadd.f32 2.0, %v704_v13  ;;  %v705_v15 = vmul.f32 %v704_v13, %v697_v0 }
 0x877   :  { %1681 = vrcp.f32 %v706_v14 }
 0x87d   :  { %v1682_v7 = vpop.eup %1681 }
 0x87e   :  { %v708_v16 = vmul.f32 %v1682_v7, %v705_v15 }
 0x880   :  { %v709_v8 = vpack.c.bf16 %v708_v16, %v708_v16 }
 0x882   :  { %1466 = vmatmul.msk.bf16.vlgmr.msrb.gmra.mxu3 %vm51_vm0, %v709_v8 }
 0x883   :  { %937 = vmatpush.bf16.msrb.mxu3 %v1943_v25 }
 0x887   :  { %938 = vmatpush.bf16.msrb.mxu3 %v1949_v26 }
 0x88b   :  { %939 = vmatpush.bf16.msrb.mxu3 %v1955_v27 }
 0x88f   :  { %940 = vmatpush.bf16.msrb.mxu3 %v1961_v28 }
 0x905   :  { %v722_v4 = vpop.f32.mrf.mxu3 }
 0x906   :  { %v723_v9 = vadd.f32 %v2007_v49, %v722_v4 }
 0x908   :  { %v726_v17 = vmin.f32 %v723_v9, 20.0 }
 0x90a   :  { %v727_v18 = vmul.f32 1.442695, %v726_v17 }
 0x90c   :  { %1683 = vpow2.f32 %v727_v18 }
 0x90d   :  { %v724_v19 = vpop.f32.mrf.mxu3 }
 0x912   :  { %v1684_v20 = vpop.eup %1683 }
 0x913   :  { %v729_v21 = vadd.f32 2.0, %v1684_v20 }
 0x915   :  { %v730_v23 = vmul.f32 %v1684_v20, %v729_v21 }
 0x917   :  { %v732_v53 = vadd.f32 2.0, %v730_v23  ;;  %v731_v24 = vmul.f32 %v730_v23, %v723_v9 }
 0x919   :  { %1685 = vrcp.f32 %v732_v53 }
 0x91f   :  { %v1686_v25 = vpop.eup %1685 }
 0x920   :  { %v734_v30 = vmul.f32 %v1686_v25, %v731_v24 }
 0x922   :  { %v735_v26 = vpack.c.bf16 %v734_v30, %v734_v30 }
 0x924   :  { %1467 = vmatmul.msk.bf16.vlgmr.msra.gmra.mxu0 %vm51_vm0, %v735_v26 }
 0x925   :  { %963 = vmatpush.bf16.msra.mxu0 %v1982_v43 }
 0x929   :  { %964 = vmatpush.bf16.msra.mxu0 %v1988_v44  ;;  %v758_v44 = vmul.f32 0.33932632, %v2065_v40 }
 0x92d   :  { %965 = vmatpush.bf16.msra.mxu0 %v1994_v45 }
 0x931   :  { %966 = vmatpush.bf16.msra.mxu0 %v2000_v47 }
 0x9a1   :  { %v748_v27 = vpop.f32.mrf.mxu0 }
 0x9a2   :  { %v749_v28 = vadd.f32 %v2021_v5, %v748_v27 }
 0x9a4   :  { %v753_v32 = vmul.f32 0.124121875, %v749_v28 }
 0x9a6   :  { %v754_v33 = vsub.f32 %v752_v31, %v753_v32  ;;  %v1476_v31 = vld [vmem:[%s2206_s0 + $0x28] sm:$0xff] }
 0x9a8   :  { %v1468_v35 = vclamps-f32 %v754_v33, 1.0 }
 0x9a9   :  { %v750_v36 = vpop.f32.mrf.mxu0 }
 0x9aa   :  { %v757_v43 = vmul.f32 0.6606671, %v1468_v35  ;;  %v872_v36 = vmul.f32 0.0009903396, %v1476_v31 }
 0x9ac   :  { %v759_v45 = vadd.f32 %v758_v44, %v757_v43 }
 0x9ae   :  { %v763_v38 = vadd.f32 %v762_v37, %v759_v45 }
 0x9b0   :  { %v764_v47 = vpack.c.bf16 %v763_v38, %v763_v38  ;;  %v862_v26 = vmul.f32 1.0025973, %v763_v38  ;;  %v868_v35 = vmul.f32 0.019276466, %v763_v38 }
 0x9b2   :  { %1470 = vmatmul.msk.bf16.vlgmr.msra.gmra.mxu1 %vm51_vm0, %v764_v47  ;;  %v1478_v47 = vld [vmem:[%s2208_s2 + $0x78] sm:$0xff] }
 0xa2f   :  { %v777_v39 = vpop.f32.mrf.mxu1 }
 0xa30   :  { %v778_v42 = vadd.f32 %v777_v39, %v1927_v10 }
 0xa32   :  { %v783_v22 = vadd.f32 %v1471_v41, %v778_v42 }
 0xa34   :  { %v784_v51 = vmin.f32 %v783_v22, 20.0 }
 0xa36   :  { %v785_v54 = vmul.f32 1.442695, %v784_v51 }
 0xa37   :  { %v779_v55 = vpop.f32.mrf.mxu1 }
 0xa38   :  { %1687 = vpow2.f32 %v785_v54 }
 0xa3e   :  { %v1688_v56 = vpop.eup %1687 }
 0xa3f   :  { %v787_v40 = vadd.f32 2.0, %v1688_v56 }
 0xa41   :  { %v788_v57 = vmul.f32 %v1688_v56, %v787_v40 }
 0xa43   :  { %v790_v58 = vadd.f32 2.0, %v788_v57  ;;  %v789_v46 = vmul.f32 %v788_v57, %v783_v22 }
 0xa45   :  { %1689 = vrcp.f32 %v790_v58 }
 0xa4b   :  { %v1690_v60 = vpop.eup %1689 }
 0xa4c   :  { %v792_v48 = vmul.f32 %v1690_v60, %v789_v46 }
 0xa4e   :  { %v793_v50 = vpack.c.bf16 %v792_v48, %v792_v48 }
 0xa50   :  { %1472 = vmatmul.msk.bf16.vlgmr.msra.gmra.mxu2 %vm51_vm0, %v793_v50 }
 0xad3   :  { %v806_v61 = vpop.f32.mrf.mxu2 }
 0xad4   :  { %v807_v52 = vadd.f32 %v1968_v29, %v806_v61 }
 0xad6   :  { %v810_v62 = vmin.f32 %v807_v52, 20.0 }
 0xad8   :  { %v811_v63 = vmul.f32 1.442695, %v810_v62 }
 0xada   :  { %1691 = vpow2.f32 %v811_v63 }
 0xadb   :  { %v808_v0 = vpop.f32.mrf.mxu2 }
 0xae0   :  { %v1692_v1 = vpop.eup %1691 }
 0xae1   :  { %v813_v2 = vadd.f32 2.0, %v1692_v1 }
 0xae3   :  { %v814_v6 = vmul.f32 %v1692_v1, %v813_v2 }
 0xae5   :  { %v816_v11 = vadd.f32 2.0, %v814_v6  ;;  %v815_v12 = vmul.f32 %v814_v6, %v807_v52 }
 0xae7   :  { %1693 = vrcp.f32 %v816_v11 }
 0xaed   :  { %v1694_v13 = vpop.eup %1693 }
 0xaee   :  { %v818_v14 = vmul.f32 %v1694_v13, %v815_v12  ;;  %v1627_v12 = vld [vmem:[%s2207_s1 + $0x138] sm:$0xff] }
 0xaef   :  { %1024 = vmatpush.bf16.msra.mxu1 %v1627_v12 }
 0xaf0   :  { %v819_v15 = vpack.c.bf16 %v818_v14, %v818_v14 }
 0xaf2   :  { %1473 = vmatmul.msk.bf16.vlgmr.msra.gmra.mxu3 %vm51_vm0, %v819_v15 }
 0xb75   :  { %v832_v7 = vpop.f32.mrf.mxu3 }
 0xb76   :  { %v833_v16 = vadd.f32 %v2007_v49, %v832_v7 }
 0xb78   :  { %v836_v8 = vmin.f32 %v833_v16, 20.0 }
 0xb7a   :  { %v837_v4 = vmul.f32 1.442695, %v836_v8 }
 0xb7c   :  { %1695 = vpow2.f32 %v837_v4 }
 0xb7d   :  { %v834_v9 = vpop.f32.mrf.mxu3 }
 0xb82   :  { %v1696_v17 = vpop.eup %1695 }
 0xb83   :  { %v839_v18 = vadd.f32 2.0, %v1696_v17 }
 0xb85   :  { %v840_v19 = vmul.f32 %v1696_v17, %v839_v18 }
 0xb87   :  { %v842_v20 = vadd.f32 2.0, %v840_v19  ;;  %v841_v21 = vmul.f32 %v840_v19, %v833_v16 }
 0xb89   :  { %1697 = vrcp.f32 %v842_v20 }
 0xb8f   :  { %v1698_v23 = vpop.eup %1697 }
 0xb90   :  { %v844_v53 = vmul.f32 %v1698_v23, %v841_v21  ;;  %v1625_v21 = vld [vmem:[%s2207_s1 + $0x128] sm:$0xff]  ;;  %v1624_v23 = vld [vmem:[%s2207_s1 + $0x120] sm:$0xff] }
 0xb92   :  { %v845_v24 = vpack.c.bf16 %v844_v53, %v844_v53  ;;  %v1631_v53 = vld [vmem:[%s2207_s1 + $0x158] sm:$0xff] }
 0xb93   :  { %1077 = vmatpush.bf16.msra.mxu2 %v1631_v53 }
 0xb94   :  { %1474 = vmatmul.msk.bf16.vlgmr.msrb.gmra.mxu0 %vm51_vm0, %v845_v24  ;;  %v1630_v24 = vld [vmem:[%s2207_s1 + $0x150] sm:$0xff] }
 0xb97   :  { %1078 = vmatpush.bf16.msra.mxu2 %v1630_v24 }
 0xc11   :  { %v858_v25 = vpop.f32.mrf.mxu0 }
 0xc12   :  { %v859_v30 = vadd.f32 %v2021_v5, %v858_v25  ;;  %v1629_v25 = vld [vmem:[%s2207_s1 + $0x148] sm:$0xff] }
 0xc13   :  { %1079 = vmatpush.bf16.msra.mxu2 %v1629_v25 }
 0xc14   :  { %v863_v27 = vmul.f32 0.07212078, %v859_v30 }
 0xc16   :  { %v864_v28 = vsub.f32 %v862_v26, %v863_v27 }
 0xc18   :  { %v1475_v32 = vclamps-f32 %v864_v28, 1.0 }
 0xc19   :  { %v860_v33 = vpop.f32.mrf.mxu0 }
 0xc1a   :  { %v867_v34 = vmul.f32 0.9807235, %v1475_v32 }
 0xc1c   :  { %v869_v43 = vadd.f32 %v868_v35, %v867_v34 }
 0xc1e   :  { %v2115_v44 = vadd.f32 %v872_v36, %v869_v43 }
 0xc20   :  { %v874_v37 = vpack.c.bf16 %v2115_v44, %v2115_v44  ;;  %v972_v27 = vmul.f32 1.00005, %v2115_v44  ;;  %v977_v33 = vmul.f32 0.0, %v2115_v44 }
 0xc22   :  { %1477 = vmatmul.msk.bf16.vlgmr.msrb.gmra.mxu1 %vm51_vm0, %v874_v37  ;;  %v1492_v37 = vld [vmem:[%s2208_s2 + $0x38] sm:$0xff] }
 0xc9f   :  { %v887_v45 = vpop.f32.mrf.mxu1 }
 0xca0   :  { %v888_v39 = vadd.f32 %v887_v45, %v1927_v10 }
 0xca2   :  { %v893_v41 = vadd.f32 %v1478_v47, %v888_v39 }
 0xca4   :  { %v894_v42 = vmin.f32 %v893_v41, 20.0 }
 0xca6   :  { %v895_v22 = vmul.f32 1.442695, %v894_v42  ;;  %v1635_v42 = vld [vmem:[%s2207_s1 + $0x178] sm:$0xff] }
 0xca7   :  { %v889_v38 = vpop.f32.mrf.mxu1  ;;  %1138 = vmatpush.bf16.msra.mxu3 %v1635_v42 }
 0xca8   :  { %1699 = vpow2.f32 %v895_v22  ;;  %v1634_v22 = vld [vmem:[%s2207_s1 + $0x170] sm:$0xff]  ;;  %v1633_v38 = vld [vmem:[%s2207_s1 + $0x168] sm:$0xff] }
 0xcab   :  { %1139 = vmatpush.bf16.msra.mxu3 %v1634_v22 }
 0xcae   :  { %v1700_v51 = vpop.eup %1699 }
 0xcaf   :  { %v897_v54 = vadd.f32 2.0, %v1700_v51  ;;  %1140 = vmatpush.bf16.msra.mxu3 %v1633_v38 }
 0xcb1   :  { %v898_v55 = vmul.f32 %v1700_v51, %v897_v54  ;;  %v1518_v51 = vld [vmem:[%s2208_s2 + $0x40] sm:$0xff] }
 0xcb3   :  { %v900_v56 = vadd.f32 2.0, %v898_v55  ;;  %v899_v40 = vmul.f32 %v898_v55, %v893_v41 }
 0xcb5   :  { %1701 = vrcp.f32 %v900_v56 }
 0xcbb   :  { %v1702_v57 = vpop.eup %1701 }
 0xcbc   :  { %v902_v58 = vmul.f32 %v1702_v57, %v899_v40 }
 0xcbe   :  { %v903_v46 = vpack.c.bf16 %v902_v58, %v902_v58 }
 0xcc0   :  { %1479 = vmatmul.msk.bf16.vlgmr.msrb.gmra.mxu2 %vm51_vm0, %v903_v46 }
 0xd43   :  { %v916_v60 = vpop.f32.mrf.mxu2 }
 0xd44   :  { %v917_v48 = vadd.f32 %v1968_v29, %v916_v60 }
 0xd46   :  { %v920_v10 = vmin.f32 %v917_v48, 20.0 }
 0xd48   :  { %v921_v50 = vmul.f32 1.442695, %v920_v10 }
 0xd4a   :  { %1703 = vpow2.f32 %v921_v50 }
 0xd4b   :  { %v918_v61 = vpop.f32.mrf.mxu2 }
 0xd50   :  { %v1704_v52 = vpop.eup %1703 }
 0xd51   :  { %v923_v62 = vadd.f32 2.0, %v1704_v52 }
 0xd53   :  { %v924_v63 = vmul.f32 %v1704_v52, %v923_v62  ;;  %v1639_v62 = vld [vmem:[%s2207_s1 + $0x198] sm:$0xff] }
 0xd54   :  { %1199 = vmatpush.bf16.msrb.mxu0 %v1639_v62 }
 0xd55   :  { %v926_v0 = vadd.f32 2.0, %v924_v63  ;;  %v925_v1 = vmul.f32 %v924_v63, %v917_v48  ;;  %v1638_v63 = vld [vmem:[%s2207_s1 + $0x190] sm:$0xff] }
 0xd57   :  { %1705 = vrcp.f32 %v926_v0  ;;  %v1637_v0 = vld [vmem:[%s2207_s1 + $0x188] sm:$0xff] }
 0xd58   :  { %1200 = vmatpush.bf16.msrb.mxu0 %v1638_v63 }
 0xd5c   :  { %1201 = vmatpush.bf16.msrb.mxu0 %v1637_v0 }
 0xd5d   :  { %v1706_v2 = vpop.eup %1705 }
 0xd5e   :  { %v928_v6 = vmul.f32 %v1706_v2, %v925_v1  ;;  %v1636_v1 = vld [vmem:[%s2207_s1 + $0x180] sm:$0xff]  ;;  %v1544_v2 = vld [vmem:[%s2208_s2 + $0x48] sm:$0xff] }
 0xd60   :  { %v929_v11 = vpack.c.bf16 %v928_v6, %v928_v6  ;;  %1202 = vmatpush.bf16.msrb.mxu0 %v1636_v1 }
 0xd62   :  { %1480 = vmatmul.msk.bf16.vlgmr.msrb.gmra.mxu3 %vm51_vm0, %v929_v11 }
 0xde5   :  { %v942_v29 = vpop.f32.mrf.mxu3 }
 0xde6   :  { %v943_v13 = vadd.f32 %v2007_v49, %v942_v29  ;;  %v1626_v49 = vld [vmem:[%s2207_s1 + $0x130] sm:$0xff] }
 0xde7   :  { %1025 = vmatpush.bf16.msra.mxu1 %v1626_v49 }
 0xde8   :  { %v946_v14 = vmin.f32 %v943_v13, 20.0 }
 0xdea   :  { %v947_v15 = vmul.f32 1.442695, %v946_v14 }
 0xdeb   :  { %1026 = vmatpush.bf16.msra.mxu1 %v1625_v21 }
 0xdec   :  { %1707 = vpow2.f32 %v947_v15 }
 0xded   :  { %v944_v7 = vpop.f32.mrf.mxu3 }
 0xdef   :  { %1027 = vmatpush.bf16.msra.mxu1 %v1624_v23 }
 0xdf2   :  { %v1708_v16 = vpop.eup %1707 }
 0xdf3   :  { %v949_v8 = vadd.f32 2.0, %v1708_v16 }
 0xdf5   :  { %v950_v4 = vmul.f32 %v1708_v16, %v949_v8 }
 0xdf7   :  { %v952_v9 = vadd.f32 2.0, %v950_v4  ;;  %v951_v17 = vmul.f32 %v950_v4, %v943_v13 }
 0xdf9   :  { %1709 = vrcp.f32 %v952_v9 }
 0xdff   :  { %v1710_v18 = vpop.eup %1709 }
 0xe00   :  { %v954_v19 = vmul.f32 %v1710_v18, %v951_v17  ;;  %v1570_v18 = vld [vmem:[%s2208_s2 + $0x50] sm:$0xff] }
 0xe02   :  { %v955_v20 = vpack.c.bf16 %v954_v19, %v954_v19 }
 0xe04   :  { %1481 = vmatmul.msk.bf16.vlgmr.msra.gmra.mxu0 %vm51_vm0, %v955_v20 }
 0xe81   :  { %v968_v30 = vpop.f32.mrf.mxu0 }
 0xe82   :  { %v969_v26 = vadd.f32 %v2021_v5, %v968_v30  ;;  %v1628_v5 = vld [vmem:[%s2207_s1 + $0x140] sm:$0xff] }
 0xe83   :  { %1080 = vmatpush.bf16.msra.mxu2 %v1628_v5 }
 0xe84   :  { %v973_v28 = vmul.f32 0.0100005, %v969_v26 }
 0xe86   :  { %v974_v31 = vsub.f32 %v972_v27, %v973_v28 }
 0xe88   :  { %v1482_v32 = vclamps-f32 %v974_v31, 1.0 }
 0xe89   :  { %v970_v34 = vpop.f32.mrf.mxu0 }
 0xe8a   :  { %v978_v35 = vadd.f32 %v1482_v32, %v977_v33 }
 0xe8c   :  { %v2153_v36 = vclamps-f32 %v978_v35, 1.0 }
 0xe8e   :  { %v981_v43 = vpack.c.bf16 %v2153_v36, %v2153_v36  ;;  %v1209_v21 = vadd.f32 %v1881_v59, %v2153_v36 }
 0xe90   :  { %1509 = vmatmul.msk.bf16.vlgmr.msra.gmra.mxu1 %vm51_vm0, %v981_v43 }
 0xf0d   :  { %v1029_v45 = vpop.f32.mrf.mxu1 }
 0xf0e   :  { %v1030_v44 = vadd.f32 %v1492_v37, %v1029_v45 }
 0xf10   :  { %v1033_v47 = vadd.f32 %v1030_v44, %v1896_v3  ;;  %v1632_v3 = vld [vmem:[%s2207_s1 + $0x160] sm:$0xff] }
 0xf11   :  { %1141 = vmatpush.bf16.msra.mxu3 %v1632_v3 }
 0xf12   :  { %v1034_v39 = vpack.c.bf16 %v1033_v47, %v1033_v47 }
 0xf14   :  { %1535 = vmatmul.msk.bf16.vlgmr.msra.gmra.mxu2 %vm51_vm0, %v1034_v39 }
 0xf15   :  { %v1031_v41 = vpop.f32.mrf.mxu1 }
 0xf97   :  { %v1082_v54 = vpop.f32.mrf.mxu2 }
 0xf98   :  { %v1083_v55 = vadd.f32 %v1518_v51, %v1082_v54 }
 0xf9a   :  { %v1086_v56 = vmin.f32 %v1083_v55, 20.0 }
 0xf9c   :  { %v1087_v40 = vmul.f32 1.442695, %v1086_v56 }
 0xf9e   :  { %1711 = vpow2.f32 %v1087_v40 }
 0xf9f   :  { %v1084_v57 = vpop.f32.mrf.mxu2 }
 0xfa4   :  { %v1712_v58 = vpop.eup %1711 }
 0xfa5   :  { %v1089_v46 = vadd.f32 2.0, %v1712_v58 }
 0xfa7   :  { %v1090_v60 = vmul.f32 %v1712_v58, %v1089_v46 }
 0xfa9   :  { %v1092_v48 = vadd.f32 2.0, %v1090_v60  ;;  %v1091_v10 = vmul.f32 %v1090_v60, %v1083_v55 }
 0xfab   :  { %1713 = vrcp.f32 %v1092_v48 }
 0xfb1   :  { %v1714_v50 = vpop.eup %1713 }
 0xfb2   :  { %v1094_v61 = vmul.f32 %v1714_v50, %v1091_v10 }
 0xfb4   :  { %v1095_v52 = vpack.c.bf16 %v1094_v61, %v1094_v61 }
 0xfb6   :  { %1561 = vmatmul.msk.bf16.vlgmr.msra.gmra.mxu3 %vm51_vm0, %v1095_v52 }
0x1039   :  { %v1143_v6 = vpop.f32.mrf.mxu3 }
0x103a   :  { %v1144_v11 = vadd.f32 %v1544_v2, %v1143_v6 }
0x103c   :  { %v1147_v12 = vmin.f32 %v1144_v11, 20.0 }
0x103e   :  { %v1148_v29 = vmul.f32 1.442695, %v1147_v12 }
0x1040   :  { %1715 = vpow2.f32 %v1148_v29 }
0x1041   :  { %v1145_v13 = vpop.f32.mrf.mxu3 }
0x1046   :  { %v1716_v14 = vpop.eup %1715 }
0x1047   :  { %v1150_v15 = vadd.f32 2.0, %v1716_v14 }
0x1049   :  { %v1151_v7 = vmul.f32 %v1716_v14, %v1150_v15 }
0x104b   :  { %v1153_v16 = vadd.f32 2.0, %v1151_v7  ;;  %v1152_v8 = vmul.f32 %v1151_v7, %v1144_v11 }
0x104d   :  { %1717 = vrcp.f32 %v1153_v16 }
0x1053   :  { %v1718_v4 = vpop.eup %1717 }
0x1054   :  { %v1155_v9 = vmul.f32 %v1718_v4, %v1152_v8 }
0x1056   :  { %v1156_v17 = vpack.c.bf16 %v1155_v9, %v1155_v9 }
0x1058   :  { %1587 = vmatmul.msk.bf16.vlgmr.msrb.gmra.mxu0 %vm51_vm0, %v1156_v17 }
0x10d5   :  { %v1204_v19 = vpop.f32.mrf.mxu0 }
0x10d6   :  { %v1205_v20 = vadd.f32 %v1570_v18, %v1204_v19 }
0x10d8   :  { %1719 = vtanh.f32 %v1205_v20 }
0x10dd   :  { %v1206_v49 = vpop.f32.mrf.mxu0 }
0x10de   :  { %v1720_v23 = vpop.eup %1719 }
0x10df   :  { %v1210_v53 = vadd.f32 %v1720_v23, %v1209_v21 }
0x10e1   :  { %1212 = vst.msk [vmem:[#allocation2] sm:$0xff] %vm1211_vm1, %v1210_v53 }
0x10e2   :  { %1223 = dma.vmem_to_hbm [thread:$0]  %s1219_s23, 128, %s1221_s26, [#allocation3]  }
0x10e3   :  { %1745 = dma.done.wait [#allocation3], 128  }
0x10e4   :  { %1746 = vsyncadd [#allocation3], 4294967168 }
0x10e5   :  { %1228 = vsyncpa [#allocation3], 1 }

</bundles_post_ra>
